<compile_context>
chip_gen: v5e
topology: v5e:2x2
jax: 0.10.0
libtpu: 0.0.40
codegen_flags: <defaults>
</compile_context>

<pallas_src>
import functools

import jax
import jax.numpy as jnp
from jax.experimental import pallas as pl
from jax.experimental.pallas import tpu as pltpu


def _round_up(x, m):
    return (x + m - 1) // m * m


def _vmem_limit(block_bytes):
    """Scoped-VMEM request: double-buffered pipeline blocks + headroom, clamped so the same
    request also fits v7x's 64 MiB physical VMEM (v5e/v6e have 128 MiB)."""
    return int(min(max(2 * block_bytes + (4 << 20), 16 << 20), 48 << 20))


def _fc_weights_bf16(fcw_ref):
    """Present the fc weight block to the MXU as bf16.  int8 storage halves HBM bytes; the
    per-column scale is applied after the matmul (exact, since it is per output column)."""
    w = fcw_ref[...]
    if w.dtype == jnp.bfloat16:
        return w
    return w.astype(jnp.float32).astype(jnp.bfloat16)


def _lstm_gates(xh_bf16, w_bf16, bias_f32, c_prev_f32, Hp):
    """One LSTM cell update from the fused [x | h_prev] input.
    PyTorch gate order [i, f, g, o]; every slice is a full 128-lane tile; gate math in f32."""
    gates = jnp.dot(xh_bf16, w_bf16, preferred_element_type=jnp.float32) + bias_f32
    i_g = jax.nn.sigmoid(gates[:, 0 * Hp:1 * Hp])
    f_g = jax.nn.sigmoid(gates[:, 1 * Hp:2 * Hp])
    g_g = jnp.tanh(gates[:, 2 * Hp:3 * Hp])
    o_g = jax.nn.sigmoid(gates[:, 3 * Hp:4 * Hp])
    c_new = f_g * c_prev_f32 + i_g * g_g
    h_new = o_g * jnp.tanh(c_new)
    return h_new, c_new


# ----------------------------- kernels --------------------------------------------------


def make_resident_kernel(L, Hp, Xp):
    """Fast path: everything resident, single grid step, layer loop unrolled in-kernel."""

    def kernel(emb_ref, h_in_ref, c_in_ref, w_ref, b_ref,
               fcw_ref, fcs_ref, fcb_ref,
               pred_ref, h_out_ref, c_out_ref, xh_buf):
        # Layer-0 input.  NOTE: for layers > 0, columns [Hp:Xp) of xh_buf keep stale
        # embedding values; they are neutralized because the matching weight rows are
        # zero-padded in pack_params (keep that invariant if the packing changes).
        xh_buf[:, :Xp] = emb_ref[...].astype(jnp.bfloat16)
        h_new = None
        for l in range(L):                       # statically unrolled (L is small & known)
            xh_buf[:, Xp:] = h_in_ref[l].astype(jnp.bfloat16)
            h_new, c_new = _lstm_gates(xh_buf[...], w_ref[l], b_ref[l],
                                       c_in_ref[l], Hp)
            h_out_ref[l] = h_new
            c_out_ref[l] = c_new
            xh_buf[:, :Hp] = h_new.astype(jnp.bfloat16)
        # Fused classifier (inter-layer dropout is identity in eval mode).
        w_fc = _fc_weights_bf16(fcw_ref)
        pred_ref[...] = (jnp.dot(h_new.astype(jnp.bfloat16), w_fc,
                                 preferred_element_type=jnp.float32)
                         * fcs_ref[...] + fcb_ref[...])

    return kernel


def make_lstm_stream_kernel(Hp, Xp):
    """Streaming path: one grid step per LSTM layer; per-layer weights streamed HBM->VMEM."""

    def kernel(emb_ref, h_in_ref, c_in_ref, w_ref, b_ref,
               h_out_ref, c_out_ref, xh_buf):
        k = pl.program_id(0)

        @pl.when(k == 0)
        def _():
            xh_buf[:, :Xp] = emb_ref[...].astype(jnp.bfloat16)

        # Columns [Hp:Xp) hold stale layer-0 data for k > 0; zero weight rows neutralize them.
        xh_buf[:, Xp:] = h_in_ref[0].astype(jnp.bfloat16)
        h_new, c_new = _lstm_gates(xh_buf[...], w_ref[0], b_ref[0], c_in_ref[0], Hp)
        h_out_ref[0] = h_new
        c_out_ref[0] = c_new
        xh_buf[:, :Hp] = h_new.astype(jnp.bfloat16)   # carried input for the next layer

    return kernel


def fc_kernel(h_ref, w_ref, s_ref, b_ref, out_ref):
    """Classifier tile: pred[:, j*Tv:(j+1)*Tv] = (h @ W_q_tile) * scale_tile + bias_tile."""
    w = _fc_weights_bf16(w_ref)
    acc = jnp.dot(h_ref[0].astype(jnp.bfloat16), w, preferred_element_type=jnp.float32)
    out_ref[...] = acc * s_ref[...] + b_ref[...]


# ----------------------------- packing / wrappers ----------------------------------------


def pack_params(params, *, tile_v=1024, fc_weight_dtype=jnp.int8):
    """One-time weight packing (model-load time, NOT per decode step):
      * transpose + fuse [Wih ; Whh] into one (Kp, 4*Hp) block per layer,
      * combine b_ih + b_hh,
      * pad every gate / input slice to a multiple of 128 lanes (lane-dense stores),
      * LSTM weights -> bf16; fc weights -> int8 with per-column scales (or bf16),
      * classifier padded to a multiple of TILE_V columns so it tiles evenly over V.
    """
    emb_table = params["embedding"]
    E = emb_table.shape[1]
    H = params["lstm"][0][1].shape[1]          # w_hh is (4H, H)
    V = params["fc_w"].shape[0]
    L = len(params["lstm"])

    # NOTE: per-gate padding to Hp = round_up(H, 128) inflates weight bytes when
    # H % 128 != 0 (worst at tiny H) — such models take the resident fast path anyway,
    # and for H >= 512 the waste is negligible.
    Hp = _round_up(H, 128)
    Ep = _round_up(E, 128)
    Xp = max(Ep, Hp)
    Kp = Xp + Hp
    Vp0 = _round_up(V, 128)
    TILE_V = min(_round_up(tile_v, 128), Vp0)
    Vp = _round_up(V, TILE_V)

    w_all = jnp.zeros((L, Kp, 4 * Hp), jnp.float32)
    b_all = jnp.zeros((L, 1, 4 * Hp), jnp.float32)
    for l, (w_ih, w_hh, b_ih, b_hh) in enumerate(params["lstm"]):
        in_dim = w_ih.shape[1]
        b = b_ih + b_hh
        for g in range(4):
            w_all = w_all.at[l, 0:in_dim, g * Hp:g * Hp + H].set(
                jnp.transpose(w_ih[g * H:(g + 1) * H, :]))
            w_all = w_all.at[l, Xp:Xp + H, g * Hp:g * Hp + H].set(
                jnp.transpose(w_hh[g * H:(g + 1) * H, :]))
            b_all = b_all.at[l, 0, g * Hp:g * Hp + H].set(b[g * H:(g + 1) * H])

    fc_wT = jnp.zeros((Hp, Vp), jnp.float32).at[:H, :V].set(
        jnp.transpose(params["fc_w"]))
    fc_bp = jnp.zeros((1, Vp), jnp.float32).at[0, :V].set(params["fc_b"])

    if fc_weight_dtype == jnp.int8:
        absmax = jnp.max(jnp.abs(fc_wT), axis=0, keepdims=True)           # (1, Vp)
        fc_scale = jnp.where(absmax > 0.0, absmax / 127.0, 1.0)
        fc_wq = jnp.clip(jnp.round(fc_wT / fc_scale), -127.0, 127.0).astype(jnp.int8)
    else:
        fc_scale = jnp.ones((1, Vp), jnp.float32)
        fc_wq = fc_wT.astype(fc_weight_dtype)

    packed = dict(
        embedding=emb_table.astype(jnp.float32),
        w_all=w_all.astype(jnp.bfloat16),   # keep f32 here if bit-closer parity is needed
        b_all=b_all,
        fc_w=fc_wq,
        fc_scale=fc_scale,
        fc_b=fc_bp,
    )
    dims = dict(E=E, H=H, V=V, L=L, Hp=Hp, Xp=Xp, Kp=Kp, Vp=Vp,
                TILE_V=TILE_V, NV=Vp // TILE_V)
    return packed, dims


def pad_state(hidden, cell, dims):
    """Pad (L, N, H) -> (L, N, Hp) ONCE per generation; padded lanes stay exactly zero
    through the cell update, so the padded layout can be carried across decode steps."""
    padding = ((0, 0), (0, 0), (0, dims["Hp"] - dims["H"]))
    return jnp.pad(hidden, padding), jnp.pad(cell, padding)


def unpad_state(hidden_p, cell_p, dims):
    H = dims["H"]
    return hidden_p[:, :, :H], cell_p[:, :, :H]


def decoder_forward(x_ids, hidden_p, cell_p, packed, *, dims, force_streaming=False):
    """Single decode step.
    x_ids: (N,) int32;  hidden_p/cell_p: (L, N, Hp) f32 (lane-padded, see pad_state).
    Returns (predictions (N, V) f32, hidden_p (L, N, Hp), cell_p (L, N, Hp))."""
    E, V = dims["E"], dims["V"]
    Hp, Xp, Kp, Vp = dims["Hp"], dims["Xp"], dims["Kp"], dims["Vp"]
    TILE_V, NV, L = dims["TILE_V"], dims["NV"], dims["L"]
    N = x_ids.shape[0]

    # Glue: embedding gather (dropout = identity in eval mode), padded to lane width.
    emb = jnp.take(packed["embedding"], x_ids, axis=0)                 # (N, E)
    emb_p = jnp.pad(emb, ((0, 0), (0, Xp - E)))                        # (N, Xp)

    fc_itemsize = packed["fc_w"].dtype.itemsize
    weight_bytes = sum(int(a.size) * a.dtype.itemsize
                       for a in (packed["w_all"], packed["b_all"], packed["fc_w"],
                                 packed["fc_scale"], packed["fc_b"]))
    act_bytes = N * (Xp + Vp + Kp) * 4 + 4 * L * N * Hp * 4
    resident = (not force_streaming) and (weight_bytes + act_bytes) <= (12 << 20)

    if resident:
        # ------------- fast path: everything resident, single grid step -----------------
        kernel = make_resident_kernel(L, Hp, Xp)
        pred_p, h_out, c_out = pl.pallas_call(
            kernel,
            grid=(1,),
            in_specs=[
                pl.BlockSpec((N, Xp), lambda i: (0, 0)),              # embedded input
                pl.BlockSpec((L, N, Hp), lambda i: (0, 0, 0)),        # h0 (all layers)
                pl.BlockSpec((L, N, Hp), lambda i: (0, 0, 0)),        # c0 (all layers)
                pl.BlockSpec((L, Kp, 4 * Hp), lambda i: (0, 0, 0)),   # fused [Wih;Whh]^T
                pl.BlockSpec((L, 1, 4 * Hp), lambda i: (0, 0, 0)),    # combined biases
                pl.BlockSpec((Hp, Vp), lambda i: (0, 0)),             # fc_w (int8)
                pl.BlockSpec((1, Vp), lambda i: (0, 0)),              # per-column scale
                pl.BlockSpec((1, Vp), lambda i: (0, 0)),              # fc bias
            ],
            out_specs=(
                pl.BlockSpec((N, Vp), lambda i: (0, 0)),
                pl.BlockSpec((L, N, Hp), lambda i: (0, 0, 0)),
                pl.BlockSpec((L, N, Hp), lambda i: (0, 0, 0)),
            ),
            out_shape=(
                jax.ShapeDtypeStruct((N, Vp), jnp.float32),
                jax.ShapeDtypeStruct((L, N, Hp), jnp.float32),
                jax.ShapeDtypeStruct((L, N, Hp), jnp.float32),
            ),
            scratch_shapes=[pltpu.VMEM((N, Kp), jnp.bfloat16)],       # carried [x | h], bf16
            input_output_aliases={1: 1, 2: 2},                        # in-place state update
            compiler_params=pltpu.CompilerParams(
                dimension_semantics=("arbitrary",),
                vmem_limit_bytes=_vmem_limit(weight_bytes + act_bytes)),
        )(emb_p, hidden_p, cell_p, packed["w_all"], packed["b_all"],
          packed["fc_w"], packed["fc_scale"], packed["fc_b"])
        return pred_p[:, :V], h_out, c_out

    # ------------- streaming path: grid over layers, fc tiled over V --------------------
    lstm_blk = (N * Xp * 4 + 4 * N * Hp * 4             # emb + h/c in/out blocks
                + Kp * 4 * Hp * 2 + 4 * Hp * 4          # bf16 weight block + bias
                + N * Kp * 2)                           # xh scratch
    lstm_kernel = make_lstm_stream_kernel(Hp, Xp)
    h_out, c_out = pl.pallas_call(
        lstm_kernel,
        grid=(L,),
        in_specs=[
            pl.BlockSpec((N, Xp), lambda k: (0, 0)),               # embedded input (resident)
            pl.BlockSpec((1, N, Hp), lambda k: (k, 0, 0)),         # h0 (per layer)
            pl.BlockSpec((1, N, Hp), lambda k: (k, 0, 0)),         # c0 (per layer)
            pl.BlockSpec((1, Kp, 4 * Hp), lambda k: (k, 0, 0)),    # fused weights (streamed)
            pl.BlockSpec((1, 1, 4 * Hp), lambda k: (k, 0, 0)),     # combined bias
        ],
        out_specs=(
            pl.BlockSpec((1, N, Hp), lambda k: (k, 0, 0)),         # hidden out
            pl.BlockSpec((1, N, Hp), lambda k: (k, 0, 0)),         # cell out
        ),
        out_shape=(
            jax.ShapeDtypeStruct((L, N, Hp), jnp.float32),
            jax.ShapeDtypeStruct((L, N, Hp), jnp.float32),
        ),
        scratch_shapes=[pltpu.VMEM((N, Kp), jnp.bfloat16)],
        input_output_aliases={1: 0, 2: 1},
        compiler_params=pltpu.CompilerParams(
            dimension_semantics=("arbitrary",),                    # layers are sequential
            vmem_limit_bytes=_vmem_limit(lstm_blk)),
    )(emb_p, hidden_p, cell_p, packed["w_all"], packed["b_all"])

    fc_blk = (N * Hp * 4 + Hp * TILE_V * fc_itemsize
              + 2 * TILE_V * 4 + N * TILE_V * 4)
    last = L - 1
    pred_p = pl.pallas_call(
        fc_kernel,
        grid=(NV,),
        in_specs=[
            pl.BlockSpec((1, N, Hp), lambda j: (last, 0, 0)),      # last layer's h
            pl.BlockSpec((Hp, TILE_V), lambda j: (0, j)),          # fc_w tile (int8, streamed)
            pl.BlockSpec((1, TILE_V), lambda j: (0, j)),           # per-column scale
            pl.BlockSpec((1, TILE_V), lambda j: (0, j)),           # bias tile
        ],
        out_specs=pl.BlockSpec((N, TILE_V), lambda j: (0, j)),
        out_shape=jax.ShapeDtypeStruct((N, Vp), jnp.float32),
        compiler_params=pltpu.CompilerParams(
            dimension_semantics=("parallel",),                     # V tiles split across TCs
            vmem_limit_bytes=_vmem_limit(fc_blk)),
    )(h_out, packed["fc_w"], packed["fc_scale"], packed["fc_b"])

    return pred_p[:, :V], h_out, c_out


# ----------------------------- reference / test harness ----------------------------------


def init_params(key, input_size, embedding_size, hidden_size, output_size, num_layers):
    """Deterministic synthetic parameters matching nn.Embedding / nn.LSTM / nn.Linear."""
    ks = jax.random.split(key, 2 + 4 * num_layers + 2)
    k_iter = iter(ks)
    scale = 1.0 / jnp.sqrt(hidden_size)

    params = {}
    params["embedding"] = jax.random.normal(
        next(k_iter), (input_size, embedding_size), jnp.float32)
    lstm = []
    for l in range(num_layers):
        in_dim = embedding_size if l == 0 else hidden_size
        w_ih = jax.random.uniform(next(k_iter), (4 * hidden_size, in_dim),
                                  jnp.float32, -scale, scale)
        w_hh = jax.random.uniform(next(k_iter), (4 * hidden_size, hidden_size),
                                  jnp.float32, -scale, scale)
        b_ih = jax.random.uniform(next(k_iter), (4 * hidden_size,),
                                  jnp.float32, -scale, scale)
        b_hh = jax.random.uniform(next(k_iter), (4 * hidden_size,),
                                  jnp.float32, -scale, scale)
        lstm.append((w_ih, w_hh, b_ih, b_hh))
    params["lstm"] = lstm
    params["fc_w"] = jax.random.uniform(next(k_iter), (output_size, hidden_size),
                                        jnp.float32, -scale, scale)
    params["fc_b"] = jax.random.uniform(next(k_iter), (output_size,),
                                        jnp.float32, -scale, scale)
    return params


def decoder_reference(x_ids, hidden, cell, params):
    """Pure-JAX f32 reference of the PyTorch Decoder forward (eval mode)."""
    H = hidden.shape[-1]
    x = jnp.take(params["embedding"], x_ids, axis=0)
    hs, cs = [], []
    for l, (w_ih, w_hh, b_ih, b_hh) in enumerate(params["lstm"]):
        gates = x @ w_ih.T + hidden[l] @ w_hh.T + b_ih + b_hh
        i = jax.nn.sigmoid(gates[:, 0 * H:1 * H])
        f = jax.nn.sigmoid(gates[:, 1 * H:2 * H])
        g = jnp.tanh(gates[:, 2 * H:3 * H])
        o = jax.nn.sigmoid(gates[:, 3 * H:4 * H])
        c = f * cell[l] + i * g
        h = o * jnp.tanh(c)
        hs.append(h)
        cs.append(c)
        x = h
    preds = x @ params["fc_w"].T + params["fc_b"]
    return preds, jnp.stack(hs), jnp.stack(cs)


def _check(name, got, want, atol=5e-2, rtol=5e-2):
    err = float(jnp.max(jnp.abs(got - want)))
    assert bool(jnp.allclose(got, want, atol=atol, rtol=rtol)), \
        f"{name} mismatch (max abs err {err})"


def run_case(case_key, *, input_size, embedding_size, hidden_size, output_size,
             num_layers, batch, tile_v, force_streaming):
    k_p, k_x, k_h, k_c = jax.random.split(case_key, 4)
    params = init_params(k_p, input_size, embedding_size, hidden_size,
                         output_size, num_layers)
    packed, dims = pack_params(params, tile_v=tile_v)     # one-time packing (load time)

    x_ids = jax.random.randint(k_x, (batch,), 0, input_size, dtype=jnp.int32)
    hidden = jax.random.normal(k_h, (num_layers, batch, hidden_size), jnp.float32)
    cell = jax.random.normal(k_c, (num_layers, batch, hidden_size), jnp.float32)

    hidden_p, cell_p = pad_state(hidden, cell, dims)      # pad once per generation
    fwd = jax.jit(functools.partial(decoder_forward, dims=dims,
                                    force_streaming=force_streaming))
    preds, h_p, c_p = fwd(x_ids, hidden_p, cell_p, packed)
    jax.block_until_ready((preds, h_p, c_p))

    h_new, c_new = unpad_state(h_p, c_p, dims)
    assert preds.shape == (batch, output_size)
    assert h_new.shape == (num_layers, batch, hidden_size)
    assert c_new.shape == (num_layers, batch, hidden_size)

    # Correctness vs. pure-JAX f32 reference (bf16/int8 weight storage -> loose tolerance).
    preds_r, h_r, c_r = decoder_reference(x_ids, hidden, cell, params)
    _check("preds", preds, preds_r)
    _check("hidden", h_new, h_r)
    _check("cell", c_new, c_r)


if __name__ == "__main__":
    base = jax.random.PRNGKey(0)

    # 1) Demo shapes -> resident fast path (single grid step, weights VMEM-resident).
    run_case(jax.random.fold_in(base, 1),
             input_size=50, embedding_size=16, hidden_size=32, output_size=50,
             num_layers=2, batch=8, tile_v=1024, force_streaming=False)

    # 2) Same shapes forced through the streaming path (layer-gridded LSTM + V-tiled fc).
    run_case(jax.random.fold_in(base, 2),
             input_size=50, embedding_size=16, hidden_size=32, output_size=50,
             num_layers=2, batch=8, tile_v=1024, force_streaming=True)

    # 3) Streaming path with a multi-tile "parallel" classifier grid (4 V tiles).
    run_case(jax.random.fold_in(base, 3),
             input_size=64, embedding_size=128, hidden_size=128, output_size=1000,
             num_layers=3, batch=16, tile_v=256, force_streaming=True)

    print("KERNEL_OK")
</pallas_src>

<mosaic_0001>
module attributes {stable_mosaic.version = 11 : i64} {
  func.func @kernel(%arg0: i32, %arg1: memref<8x128xf32, #tpu.memory_space<vmem>>, %arg2: memref<2x8x128xf32, #tpu.memory_space<vmem>>, %arg3: memref<2x8x128xf32, #tpu.memory_space<vmem>>, %arg4: memref<2x256x512xbf16, #tpu.memory_space<vmem>>, %arg5: memref<2x1x512xf32, #tpu.memory_space<vmem>>, %arg6: memref<128x128xi8, #tpu.memory_space<vmem>>, %arg7: memref<1x128xf32, #tpu.memory_space<vmem>>, %arg8: memref<1x128xf32, #tpu.memory_space<vmem>>, %arg9: memref<8x128xf32, #tpu.memory_space<vmem>>, %arg10: memref<2x8x128xf32, #tpu.memory_space<vmem>>, %arg11: memref<2x8x128xf32, #tpu.memory_space<vmem>>, %arg12: memref<8x256xbf16, #tpu.memory_space<vmem>>) attributes {dimension_semantics = [#tpu.dimension_semantics<arbitrary>], iteration_bounds = array<i64: 1>, scalar_prefetch = 0 : i64, scratch_operands = 1 : i64, tpu.core_type = #tpu.core_type<tc>, window_params = [{pipeline_mode = #tpu.pipeline_mode<synchronous>, transform_indices = @transform_0, window_bounds = array<i64: 8, 128>}, {pipeline_mode = #tpu.pipeline_mode<synchronous>, transform_indices = @transform_1, window_bounds = array<i64: 2, 8, 128>}, {pipeline_mode = #tpu.pipeline_mode<synchronous>, transform_indices = @transform_2, window_bounds = array<i64: 2, 8, 128>}, {pipeline_mode = #tpu.pipeline_mode<synchronous>, transform_indices = @transform_3, window_bounds = array<i64: 2, 256, 512>}, {pipeline_mode = #tpu.pipeline_mode<synchronous>, transform_indices = @transform_4, window_bounds = array<i64: 2, 1, 512>}, {pipeline_mode = #tpu.pipeline_mode<synchronous>, transform_indices = @transform_5, window_bounds = array<i64: 128, 128>}, {pipeline_mode = #tpu.pipeline_mode<synchronous>, transform_indices = @transform_6, window_bounds = array<i64: 1, 128>}, {pipeline_mode = #tpu.pipeline_mode<synchronous>, transform_indices = @transform_7, window_bounds = array<i64: 1, 128>}, {pipeline_mode = #tpu.pipeline_mode<synchronous>, transform_indices = @transform_8, window_bounds = array<i64: 8, 128>}, {pipeline_mode = #tpu.pipeline_mode<synchronous>, transform_indices = @transform_9, window_bounds = array<i64: 2, 8, 128>}, {pipeline_mode = #tpu.pipeline_mode<synchronous>, transform_indices = @transform_10, window_bounds = array<i64: 2, 8, 128>}]} {
    %c0 = arith.constant 0 : index
    %c0_0 = arith.constant 0 : index
    %0 = vector.load %arg1[%c0, %c0_0] : memref<8x128xf32, #tpu.memory_space<vmem>>, vector<8x128xf32>
    %1 = arith.truncf %0 : vector<8x128xf32> to vector<8x128xbf16>
    %c0_1 = arith.constant 0 : index
    %c0_2 = arith.constant 0 : index
    %2 = vector.load %arg12[%c0_1, %c0_2] : memref<8x256xbf16, #tpu.memory_space<vmem>>, vector<8x128xbf16>
    tpu.vector_store %arg12[%c0_1, %c0_2], %1 {strides = array<i32>} : memref<8x256xbf16, #tpu.memory_space<vmem>>, vector<8x128xbf16>,
    %c0_3 = arith.constant 0 : index
    %c0_4 = arith.constant 0 : index
    %c0_5 = arith.constant 0 : index
    %3 = vector.load %arg2[%c0_3, %c0_4, %c0_5] : memref<2x8x128xf32, #tpu.memory_space<vmem>>, vector<1x8x128xf32>
    %4 = vector.shape_cast %3 : vector<1x8x128xf32> to vector<8x128xf32>
    %5 = arith.truncf %4 : vector<8x128xf32> to vector<8x128xbf16>
    %c0_6 = arith.constant 0 : index
    %c128 = arith.constant 128 : index
    %6 = vector.load %arg12[%c0_6, %c128] : memref<8x256xbf16, #tpu.memory_space<vmem>>, vector<8x128xbf16>
    tpu.vector_store %arg12[%c0_6, %c128], %5 {strides = array<i32>} : memref<8x256xbf16, #tpu.memory_space<vmem>>, vector<8x128xbf16>,
    %c0_7 = arith.constant 0 : index
    %c0_8 = arith.constant 0 : index
    %7 = vector.load %arg12[%c0_7, %c0_8] : memref<8x256xbf16, #tpu.memory_space<vmem>>, vector<8x256xbf16>
    %c0_9 = arith.constant 0 : index
    %c0_10 = arith.constant 0 : index
    %c0_11 = arith.constant 0 : index
    %8 = vector.load %arg4[%c0_9, %c0_10, %c0_11] : memref<2x256x512xbf16, #tpu.memory_space<vmem>>, vector<1x256x512xbf16>
    %9 = vector.shape_cast %8 : vector<1x256x512xbf16> to vector<256x512xbf16>
    %c0_12 = arith.constant 0 : index
    %c0_13 = arith.constant 0 : index
    %c0_14 = arith.constant 0 : index
    %10 = vector.load %arg5[%c0_12, %c0_13, %c0_14] : memref<2x1x512xf32, #tpu.memory_space<vmem>>, vector<1x1x512xf32>
    %11 = vector.shape_cast %10 : vector<1x1x512xf32> to vector<1x512xf32>
    %c0_15 = arith.constant 0 : index
    %c0_16 = arith.constant 0 : index
    %c0_17 = arith.constant 0 : index
    %12 = vector.load %arg3[%c0_15, %c0_16, %c0_17] : memref<2x8x128xf32, #tpu.memory_space<vmem>>, vector<1x8x128xf32>
    %13 = vector.shape_cast %12 : vector<1x8x128xf32> to vector<8x128xf32>
    %cst = arith.constant dense<0.000000e+00> : vector<8x512xf32>
    %14 = tpu.matmul %7, %9, %cst {dimension_numbers = #tpu.dot_dimension_numbers<[1], [0], [0], [1], [0, 0, 1, 1], [], []>} : vector<8x256xbf16>, vector<256x512xbf16>, vector<8x512xf32> -> vector<8x512xf32>
    %15 = vector.broadcast %11 : vector<1x512xf32> to vector<8x512xf32>
    %16 = arith.addf %14, %15 : vector<8x512xf32>
    %17 = vector.extract_strided_slice %16 {offsets = [0, 0], sizes = [8, 128], strides = [1, 1]} : vector<8x512xf32> to vector<8x128xf32>
    %18 = arith.negf %17 : vector<8x128xf32>
    %19 = math.exp %18 : vector<8x128xf32>
    %cst_18 = arith.constant 1.000000e+00 : f32
    %20 = vector.broadcast %cst_18 : f32 to vector<8x128xf32>
    %21 = arith.addf %20, %19 : vector<8x128xf32>
    %22 = arith.divf %20, %21 : vector<8x128xf32>
    %23 = vector.extract_strided_slice %16 {offsets = [0, 128], sizes = [8, 128], strides = [1, 1]} : vector<8x512xf32> to vector<8x128xf32>
    %24 = arith.negf %23 : vector<8x128xf32>
    %25 = math.exp %24 : vector<8x128xf32>
    %cst_19 = arith.constant 1.000000e+00 : f32
    %26 = vector.broadcast %cst_19 : f32 to vector<8x128xf32>
    %27 = arith.addf %26, %25 : vector<8x128xf32>
    %28 = arith.divf %26, %27 : vector<8x128xf32>
    %29 = vector.extract_strided_slice %16 {offsets = [0, 256], sizes = [8, 128], strides = [1, 1]} : vector<8x512xf32> to vector<8x128xf32>
    %30 = math.tanh %29 : vector<8x128xf32>
    %31 = vector.extract_strided_slice %16 {offsets = [0, 384], sizes = [8, 128], strides = [1, 1]} : vector<8x512xf32> to vector<8x128xf32>
    %32 = arith.negf %31 : vector<8x128xf32>
    %33 = math.exp %32 : vector<8x128xf32>
    %cst_20 = arith.constant 1.000000e+00 : f32
    %34 = vector.broadcast %cst_20 : f32 to vector<8x128xf32>
    %35 = arith.addf %34, %33 : vector<8x128xf32>
    %36 = arith.divf %34, %35 : vector<8x128xf32>
    %37 = arith.mulf %28, %13 : vector<8x128xf32>
    %38 = arith.mulf %22, %30 : vector<8x128xf32>
    %39 = arith.addf %37, %38 : vector<8x128xf32>
    %40 = math.tanh %39 : vector<8x128xf32>
    %41 = arith.mulf %36, %40 : vector<8x128xf32>
    %c0_21 = arith.constant 0 : index
    %c0_22 = arith.constant 0 : index
    %c0_23 = arith.constant 0 : index
    %42 = vector.load %arg10[%c0_21, %c0_22, %c0_23] : memref<2x8x128xf32, #tpu.memory_space<vmem>>, vector<1x8x128xf32>
    %43 = vector.shape_cast %42 : vector<1x8x128xf32> to vector<8x128xf32>
    %44 = vector.shape_cast %41 : vector<8x128xf32> to vector<1x8x128xf32>
    tpu.vector_store %arg10[%c0_21, %c0_22, %c0_23], %44 {strides = array<i32>} : memref<2x8x128xf32, #tpu.memory_space<vmem>>, vector<1x8x128xf32>,
    %c0_24 = arith.constant 0 : index
    %c0_25 = arith.constant 0 : index
    %c0_26 = arith.constant 0 : index
    %45 = vector.load %arg11[%c0_24, %c0_25, %c0_26] : memref<2x8x128xf32, #tpu.memory_space<vmem>>, vector<1x8x128xf32>
    %46 = vector.shape_cast %45 : vector<1x8x128xf32> to vector<8x128xf32>
    %47 = vector.shape_cast %39 : vector<8x128xf32> to vector<1x8x128xf32>
    tpu.vector_store %arg11[%c0_24, %c0_25, %c0_26], %47 {strides = array<i32>} : memref<2x8x128xf32, #tpu.memory_space<vmem>>, vector<1x8x128xf32>,
    %48 = arith.truncf %41 : vector<8x128xf32> to vector<8x128xbf16>
    %c0_27 = arith.constant 0 : index
    %c0_28 = arith.constant 0 : index
    %49 = vector.load %arg12[%c0_27, %c0_28] : memref<8x256xbf16, #tpu.memory_space<vmem>>, vector<8x128xbf16>
    tpu.vector_store %arg12[%c0_27, %c0_28], %48 {strides = array<i32>} : memref<8x256xbf16, #tpu.memory_space<vmem>>, vector<8x128xbf16>,
    %c1 = arith.constant 1 : index
    %c0_29 = arith.constant 0 : index
    %c0_30 = arith.constant 0 : index
    %50 = vector.load %arg2[%c1, %c0_29, %c0_30] : memref<2x8x128xf32, #tpu.memory_space<vmem>>, vector<1x8x128xf32>
    %51 = vector.shape_cast %50 : vector<1x8x128xf32> to vector<8x128xf32>
    %52 = arith.truncf %51 : vector<8x128xf32> to vector<8x128xbf16>
    %c0_31 = arith.constant 0 : index
    %c128_32 = arith.constant 128 : index
    %53 = vector.load %arg12[%c0_31, %c128_32] : memref<8x256xbf16, #tpu.memory_space<vmem>>, vector<8x128xbf16>
    tpu.vector_store %arg12[%c0_31, %c128_32], %52 {strides = array<i32>} : memref<8x256xbf16, #tpu.memory_space<vmem>>, vector<8x128xbf16>,
    %c0_33 = arith.constant 0 : index
    %c0_34 = arith.constant 0 : index
    %54 = vector.load %arg12[%c0_33, %c0_34] : memref<8x256xbf16, #tpu.memory_space<vmem>>, vector<8x256xbf16>
    %c1_35 = arith.constant 1 : index
    %c0_36 = arith.constant 0 : index
    %c0_37 = arith.constant 0 : index
    %55 = vector.load %arg4[%c1_35, %c0_36, %c0_37] : memref<2x256x512xbf16, #tpu.memory_space<vmem>>, vector<1x256x512xbf16>
    %56 = vector.shape_cast %55 : vector<1x256x512xbf16> to vector<256x512xbf16>
    %c1_38 = arith.constant 1 : index
    %c0_39 = arith.constant 0 : index
    %c0_40 = arith.constant 0 : index
    %57 = vector.load %arg5[%c1_38, %c0_39, %c0_40] : memref<2x1x512xf32, #tpu.memory_space<vmem>>, vector<1x1x512xf32>
    %58 = vector.shape_cast %57 : vector<1x1x512xf32> to vector<1x512xf32>
    %c1_41 = arith.constant 1 : index
    %c0_42 = arith.constant 0 : index
    %c0_43 = arith.constant 0 : index
    %59 = vector.load %arg3[%c1_41, %c0_42, %c0_43] : memref<2x8x128xf32, #tpu.memory_space<vmem>>, vector<1x8x128xf32>
    %60 = vector.shape_cast %59 : vector<1x8x128xf32> to vector<8x128xf32>
    %cst_44 = arith.constant dense<0.000000e+00> : vector<8x512xf32>
    %61 = tpu.matmul %54, %56, %cst_44 {dimension_numbers = #tpu.dot_dimension_numbers<[1], [0], [0], [1], [0, 0, 1, 1], [], []>} : vector<8x256xbf16>, vector<256x512xbf16>, vector<8x512xf32> -> vector<8x512xf32>
    %62 = vector.broadcast %58 : vector<1x512xf32> to vector<8x512xf32>
    %63 = arith.addf %61, %62 : vector<8x512xf32>
    %64 = vector.extract_strided_slice %63 {offsets = [0, 0], sizes = [8, 128], strides = [1, 1]} : vector<8x512xf32> to vector<8x128xf32>
    %65 = arith.negf %64 : vector<8x128xf32>
    %66 = math.exp %65 : vector<8x128xf32>
    %cst_45 = arith.constant 1.000000e+00 : f32
    %67 = vector.broadcast %cst_45 : f32 to vector<8x128xf32>
    %68 = arith.addf %67, %66 : vector<8x128xf32>
    %69 = arith.divf %67, %68 : vector<8x128xf32>
    %70 = vector.extract_strided_slice %63 {offsets = [0, 128], sizes = [8, 128], strides = [1, 1]} : vector<8x512xf32> to vector<8x128xf32>
    %71 = arith.negf %70 : vector<8x128xf32>
    %72 = math.exp %71 : vector<8x128xf32>
    %cst_46 = arith.constant 1.000000e+00 : f32
    %73 = vector.broadcast %cst_46 : f32 to vector<8x128xf32>
    %74 = arith.addf %73, %72 : vector<8x128xf32>
    %75 = arith.divf %73, %74 : vector<8x128xf32>
    %76 = vector.extract_strided_slice %63 {offsets = [0, 256], sizes = [8, 128], strides = [1, 1]} : vector<8x512xf32> to vector<8x128xf32>
    %77 = math.tanh %76 : vector<8x128xf32>
    %78 = vector.extract_strided_slice %63 {offsets = [0, 384], sizes = [8, 128], strides = [1, 1]} : vector<8x512xf32> to vector<8x128xf32>
    %79 = arith.negf %78 : vector<8x128xf32>
    %80 = math.exp %79 : vector<8x128xf32>
    %cst_47 = arith.constant 1.000000e+00 : f32
    %81 = vector.broadcast %cst_47 : f32 to vector<8x128xf32>
    %82 = arith.addf %81, %80 : vector<8x128xf32>
    %83 = arith.divf %81, %82 : vector<8x128xf32>
    %84 = arith.mulf %75, %60 : vector<8x128xf32>
    %85 = arith.mulf %69, %77 : vector<8x128xf32>
    %86 = arith.addf %84, %85 : vector<8x128xf32>
    %87 = math.tanh %86 : vector<8x128xf32>
    %88 = arith.mulf %83, %87 : vector<8x128xf32>
    %c1_48 = arith.constant 1 : index
    %c0_49 = arith.constant 0 : index
    %c0_50 = arith.constant 0 : index
    %89 = vector.load %arg10[%c1_48, %c0_49, %c0_50] : memref<2x8x128xf32, #tpu.memory_space<vmem>>, vector<1x8x128xf32>
    %90 = vector.shape_cast %89 : vector<1x8x128xf32> to vector<8x128xf32>
    %91 = vector.shape_cast %88 : vector<8x128xf32> to vector<1x8x128xf32>
    tpu.vector_store %arg10[%c1_48, %c0_49, %c0_50], %91 {strides = array<i32>} : memref<2x8x128xf32, #tpu.memory_space<vmem>>, vector<1x8x128xf32>,
    %c1_51 = arith.constant 1 : index
    %c0_52 = arith.constant 0 : index
    %c0_53 = arith.constant 0 : index
    %92 = vector.load %arg11[%c1_51, %c0_52, %c0_53] : memref<2x8x128xf32, #tpu.memory_space<vmem>>, vector<1x8x128xf32>
    %93 = vector.shape_cast %92 : vector<1x8x128xf32> to vector<8x128xf32>
    %94 = vector.shape_cast %86 : vector<8x128xf32> to vector<1x8x128xf32>
    tpu.vector_store %arg11[%c1_51, %c0_52, %c0_53], %94 {strides = array<i32>} : memref<2x8x128xf32, #tpu.memory_space<vmem>>, vector<1x8x128xf32>,
    %95 = arith.truncf %88 : vector<8x128xf32> to vector<8x128xbf16>
    %c0_54 = arith.constant 0 : index
    %c0_55 = arith.constant 0 : index
    %96 = vector.load %arg12[%c0_54, %c0_55] : memref<8x256xbf16, #tpu.memory_space<vmem>>, vector<8x128xbf16>
    tpu.vector_store %arg12[%c0_54, %c0_55], %95 {strides = array<i32>} : memref<8x256xbf16, #tpu.memory_space<vmem>>, vector<8x128xbf16>,
    %c0_56 = arith.constant 0 : index
    %c0_57 = arith.constant 0 : index
    %97 = vector.load %arg6[%c0_56, %c0_57] : memref<128x128xi8, #tpu.memory_space<vmem>>, vector<128x128xi8>
    %98 = arith.sitofp %97 : vector<128x128xi8> to vector<128x128xf32>
    %99 = arith.truncf %98 : vector<128x128xf32> to vector<128x128xbf16>
    %100 = arith.truncf %88 : vector<8x128xf32> to vector<8x128xbf16>
    %cst_58 = arith.constant dense<0.000000e+00> : vector<8x128xf32>
    %101 = tpu.matmul %100, %99, %cst_58 {dimension_numbers = #tpu.dot_dimension_numbers<[1], [0], [0], [1], [0, 0, 1, 1], [], []>} : vector<8x128xbf16>, vector<128x128xbf16>, vector<8x128xf32> -> vector<8x128xf32>
    %c0_59 = arith.constant 0 : index
    %c0_60 = arith.constant 0 : index
    %102 = vector.load %arg7[%c0_59, %c0_60] : memref<1x128xf32, #tpu.memory_space<vmem>>, vector<1x128xf32>
    %103 = vector.broadcast %102 : vector<1x128xf32> to vector<8x128xf32>
    %104 = arith.mulf %101, %103 : vector<8x128xf32>
    %c0_61 = arith.constant 0 : index
    %c0_62 = arith.constant 0 : index
    %105 = vector.load %arg8[%c0_61, %c0_62] : memref<1x128xf32, #tpu.memory_space<vmem>>, vector<1x128xf32>
    %106 = vector.broadcast %105 : vector<1x128xf32> to vector<8x128xf32>
    %107 = arith.addf %104, %106 : vector<8x128xf32>
    %c0_63 = arith.constant 0 : index
    %c0_64 = arith.constant 0 : index
    %108 = vector.load %arg9[%c0_63, %c0_64] : memref<8x128xf32, #tpu.memory_space<vmem>>, vector<8x128xf32>
    tpu.vector_store %arg9[%c0_63, %c0_64], %107 {strides = array<i32>} : memref<8x128xf32, #tpu.memory_space<vmem>>, vector<8x128xf32>,
    return
  }
  func.func @transform_0(%arg0: i32) -> (i32, i32) {
    %c0_i32 = arith.constant 0 : i32
    %c0_i32_0 = arith.constant 0 : i32
    %c0_i32_1 = arith.constant 0 : i32
    return %c0_i32, %c0_i32_0 : i32, i32
  }
  func.func @transform_1(%arg0: i32) -> (i32, i32, i32) {
    %c0_i32 = arith.constant 0 : i32
    %c0_i32_0 = arith.constant 0 : i32
    %c0_i32_1 = arith.constant 0 : i32
    %c0_i32_2 = arith.constant 0 : i32
    return %c0_i32, %c0_i32_0, %c0_i32_1 : i32, i32, i32
  }
  func.func @transform_2(%arg0: i32) -> (i32, i32, i32) {
    %c0_i32 = arith.constant 0 : i32
    %c0_i32_0 = arith.constant 0 : i32
    %c0_i32_1 = arith.constant 0 : i32
    %c0_i32_2 = arith.constant 0 : i32
    return %c0_i32, %c0_i32_0, %c0_i32_1 : i32, i32, i32
  }
  func.func @transform_3(%arg0: i32) -> (i32, i32, i32) {
    %c0_i32 = arith.constant 0 : i32
    %c0_i32_0 = arith.constant 0 : i32
    %c0_i32_1 = arith.constant 0 : i32
    %c0_i32_2 = arith.constant 0 : i32
    return %c0_i32, %c0_i32_0, %c0_i32_1 : i32, i32, i32
  }
  func.func @transform_4(%arg0: i32) -> (i32, i32, i32) {
    %c0_i32 = arith.constant 0 : i32
    %c0_i32_0 = arith.constant 0 : i32
    %c0_i32_1 = arith.constant 0 : i32
    %c0_i32_2 = arith.constant 0 : i32
    return %c0_i32, %c0_i32_0, %c0_i32_1 : i32, i32, i32
  }
  func.func @transform_5(%arg0: i32) -> (i32, i32) {
    %c0_i32 = arith.constant 0 : i32
    %c0_i32_0 = arith.constant 0 : i32
    %c0_i32_1 = arith.constant 0 : i32
    return %c0_i32, %c0_i32_0 : i32, i32
  }
  func.func @transform_6(%arg0: i32) -> (i32, i32) {
    %c0_i32 = arith.constant 0 : i32
    %c0_i32_0 = arith.constant 0 : i32
    %c0_i32_1 = arith.constant 0 : i32
    return %c0_i32, %c0_i32_0 : i32, i32
  }
  func.func @transform_7(%arg0: i32) -> (i32, i32) {
    %c0_i32 = arith.constant 0 : i32
    %c0_i32_0 = arith.constant 0 : i32
    %c0_i32_1 = arith.constant 0 : i32
    return %c0_i32, %c0_i32_0 : i32, i32
  }
  func.func @transform_8(%arg0: i32) -> (i32, i32) {
    %c0_i32 = arith.constant 0 : i32
    %c0_i32_0 = arith.constant 0 : i32
    %c0_i32_1 = arith.constant 0 : i32
    return %c0_i32, %c0_i32_0 : i32, i32
  }
  func.func @transform_9(%arg0: i32) -> (i32, i32, i32) {
    %c0_i32 = arith.constant 0 : i32
    %c0_i32_0 = arith.constant 0 : i32
    %c0_i32_1 = arith.constant 0 : i32
    %c0_i32_2 = arith.constant 0 : i32
    return %c0_i32, %c0_i32_0, %c0_i32_1 : i32, i32, i32
  }
  func.func @transform_10(%arg0: i32) -> (i32, i32, i32) {
    %c0_i32 = arith.constant 0 : i32
    %c0_i32_0 = arith.constant 0 : i32
    %c0_i32_1 = arith.constant 0 : i32
    %c0_i32_2 = arith.constant 0 : i32
    return %c0_i32, %c0_i32_0, %c0_i32_1 : i32, i32, i32
  }
}

</mosaic_0001>

<bundles_post_ra>
// kernel: decoder_forward.1
= control target key start
LH: loop header
LB: loop body
LE: loop exit
PB: predicated region body
PF: predicated region fallthrough
CT: control target
= control target key end

     0   :  { %16 = vsyncpa [#allocation4], 0  ;;  %s2272_s0 = inlined_call_operand.vmem [shape: f32[8,128], index: 0, kind: input, shape index: {}]   ;;  %s2273_s1 = inlined_call_operand.vmem [shape: f32[2,8,128], index: 1, kind: input, shape index: {}, may-alias: {1,9}]   ;;  %s2274_s2 = inlined_call_operand.vmem [shape: f32[2,8,128], index: 2, kind: input, shape index: {}, may-alias: {2,10}]   ;;  %s2275_s3 = inlined_call_operand.hbm [shape: bf16[2,256,512], index: 3, kind: input, shape index: {}]   ;;  %s2276_s4 = inlined_call_operand.vmem [shape: f32[2,1,512], index: 4, kind: input, shape index: {}]   ;;  %s2277_s5 = inlined_call_operand.vmem [shape: s8[128,128], index: 5, kind: input, shape index: {}]   ;;  %s2278_s6 = inlined_call_operand.vmem [shape: f32[1,128], index: 6, kind: input, shape index: {}]   ;;  %s2279_s7 = inlined_call_operand.vmem [shape: f32[1,128], index: 7, kind: input, shape index: {}]   ;;  %s2280_s8 = inlined_call_operand.hbm [shape: f32[8,128], index: 8, kind: output, shape index: {0}]   ;;  %s2281_s9 = inlined_call_operand.vmem [shape: f32[2,8,128], index: 9, kind: output, shape index: {1}, may-alias: {1,9}]   ;;  %s2282_s10 = inlined_call_operand.vmem [shape: f32[2,8,128], index: 10, kind: output, shape index: {2}, may-alias: {2,10}]  }
   0x1   :  { %17 = vsyncpa [#allocation5], 0  ;;  %s28_s15 = sshll.u32 %s2275_s3, 4  ;;  %s2056_s16 = smov [#allocation3]   ;;  %s29_s15 = int_to_ptr.hbm [resolvable:$true] %s28_s15 }
   0x2   :  { %s30_s17 = sshll.u32 %s2056_s16, 4  ;;  %s2057_s18 = smov 256   ;;  %s31_s17 = int_to_ptr.vmem [resolvable:$true] %s30_s17 }
   0x3   :  { %s2058_s19 = smov 16  }
   0x4   :  { %36 = dma.hbm_to_vmem [thread:$0]  %s29_s15, 16384, %s31_s17, [#allocation4], %s2057_s18, %s2057_s18, %s2058_s19  }
   0x5   :  { %2052 = dma.done.wait [#allocation4], 16384  }
   0x6   :  { %2053 = vsyncadd [#allocation4], 4294950912  ;;  %v1419_v0 = vld [vmem:[#allocation3 + $0xe0] sm:$0xf]  ;;  %v1858_v1 = vld [vmem:[#allocation3 + $0xec] sm:$0xf0] }
   0x7   :  { %v1856_v2 = vld [vmem:[#allocation3 + $0xe4] sm:$0xf]  ;;  %v1420_v3 = vor.u32 %v1858_v1, %v1419_v0  ;;  %v1421_v4 = vld [vmem:[#allocation3 + $0xf0] sm:$0xf0]  ;;  %v1547_v9 = vld [vmem:[#allocation3 + $0x1e0] sm:$0xf] }
   0x8   :  { %v1888_v5 = vld [vmem:[#allocation3 + $0x1e4] sm:$0xf]  ;;  %v1549_v6 = vld [vmem:[#allocation3 + $0x1f0] sm:$0xf0]  ;;  %v1424_v7 = vor.u32 %v1856_v2, %v1421_v4  ;;  %v1890_v10 = vld [vmem:[#allocation3 + $0x1ec] sm:$0xf0] }
   0x9   :  { %v1552_v8 = vor.u32 %v1888_v5, %v1549_v6  ;;  %v1403_v11 = vld [vmem:[#allocation3 + $0xc0] sm:$0xf]  ;;  %458 = vmatpush.bf16.msra.mxu0 %v1420_v3  ;;  %v1548_v12 = vor.u32 %v1890_v10, %v1547_v9  ;;  %v1854_v13 = vld [vmem:[#allocation3 + $0xcc] sm:$0xf0]  ;;  %v1852_v14 = vld [vmem:[#allocation3 + $0xc4] sm:$0xf] }
   0xa   :  { %v1405_v15 = vld [vmem:[#allocation3 + $0xd0] sm:$0xf0]  ;;  %484 = vmatpush.bf16.msra.mxu2 %v1424_v7  ;;  %v1404_v16 = vor.u32 %v1854_v13, %v1403_v11  ;;  %v1884_v18 = vld [vmem:[#allocation3 + $0x1c4] sm:$0xf]  ;;  %v1531_v20 = vld [vmem:[#allocation3 + $0x1c0] sm:$0xf] }
   0xb   :  { %497 = vmatpush.bf16.msra.mxu3 %v1552_v8  ;;  %v1408_v17 = vor.u32 %v1852_v14, %v1405_v15  ;;  %v1533_v19 = vld [vmem:[#allocation3 + $0x1d0] sm:$0xf0]  ;;  %471 = vmatpush.bf16.msra.mxu1 %v1548_v12  ;;  %v1886_v22 = vld [vmem:[#allocation3 + $0x1cc] sm:$0xf0]  ;;  %v1387_v23 = vld [vmem:[#allocation3 + $0xa0] sm:$0xf] }
   0xc   :  { %v1536_v21 = vor.u32 %v1884_v18, %v1533_v19  ;;  %v1850_v24 = vld [vmem:[#allocation3 + $0xac] sm:$0xf0]  ;;  %v1532_v25 = vor.u32 %v1886_v22, %v1531_v20  ;;  %v1848_v26 = vld [vmem:[#allocation3 + $0xa4] sm:$0xf]  ;;  %v1389_v27 = vld [vmem:[#allocation3 + $0xb0] sm:$0xf0] }
   0xd   :  { %v1880_v28 = vld [vmem:[#allocation3 + $0x1a4] sm:$0xf]  ;;  %459 = vmatpush.bf16.msra.mxu0 %v1404_v16  ;;  %v1388_v29 = vor.u32 %v1850_v24, %v1387_v23  ;;  %v1517_v30 = vld [vmem:[#allocation3 + $0x1b0] sm:$0xf0]  ;;  %v1515_v31 = vld [vmem:[#allocation3 + $0x1a0] sm:$0xf]  ;;  %v1392_v33 = vor.u32 %v1848_v26, %v1389_v27 }
   0xe   :  { %v1882_v32 = vld [vmem:[#allocation3 + $0x1ac] sm:$0xf0]  ;;  %485 = vmatpush.bf16.msra.mxu2 %v1408_v17  ;;  %v1520_v34 = vor.u32 %v1880_v28, %v1517_v30  ;;  %v1371_v35 = vld [vmem:[#allocation3 + $0x80] sm:$0xf]  ;;  %v1844_v37 = vld [vmem:[#allocation3 + $0x84] sm:$0xf] }
   0xf   :  { %498 = vmatpush.bf16.msra.mxu3 %v1536_v21  ;;  %v1846_v36 = vld [vmem:[#allocation3 + $0x8c] sm:$0xf0]  ;;  %472 = vmatpush.bf16.msra.mxu1 %v1532_v25  ;;  %v1516_v38 = vor.u32 %v1882_v32, %v1515_v31  ;;  %v1373_v39 = vld [vmem:[#allocation3 + $0x90] sm:$0xf0]  ;;  %v1876_v40 = vld [vmem:[#allocation3 + $0x184] sm:$0xf] }
  0x10   :  { %v1501_v41 = vld [vmem:[#allocation3 + $0x190] sm:$0xf0]  ;;  %v1499_v42 = vld [vmem:[#allocation3 + $0x180] sm:$0xf]  ;;  %v1878_v43 = vld [vmem:[#allocation3 + $0x18c] sm:$0xf0]  ;;  %v1372_v44 = vor.u32 %v1846_v36, %v1371_v35  ;;  %v1376_v45 = vor.u32 %v1844_v37, %v1373_v39 }
  0x11   :  { %460 = vmatpush.bf16.msra.mxu0 %v1388_v29  ;;  %v1504_v46 = vor.u32 %v1876_v40, %v1501_v41  ;;  %v1355_v47 = vld [vmem:[#allocation3 + $0x60] sm:$0xf]  ;;  %v1842_v48 = vld [vmem:[#allocation3 + $0x6c] sm:$0xf0]  ;;  %v1840_v49 = vld [vmem:[#allocation3 + $0x64] sm:$0xf]  ;;  %v1500_v50 = vor.u32 %v1878_v43, %v1499_v42 }
  0x12   :  { %486 = vmatpush.bf16.msra.mxu2 %v1392_v33  ;;  %v1357_v51 = vld [vmem:[#allocation3 + $0x70] sm:$0xf0]  ;;  %v1872_v52 = vld [vmem:[#allocation3 + $0x164] sm:$0xf]  ;;  %v1483_v54 = vld [vmem:[#allocation3 + $0x160] sm:$0xf]  ;;  %v1356_v56 = vor.u32 %v1842_v48, %v1355_v47 }
  0x13   :  { %499 = vmatpush.bf16.msra.mxu3 %v1520_v34  ;;  %473 = vmatpush.bf16.msra.mxu1 %v1516_v38  ;;  %v1485_v53 = vld [vmem:[#allocation3 + $0x170] sm:$0xf0]  ;;  %v1874_v55 = vld [vmem:[#allocation3 + $0x16c] sm:$0xf0]  ;;  %v1360_v57 = vor.u32 %v1840_v49, %v1357_v51  ;;  %v1339_v59 = vld [vmem:[#allocation3 + $0x40] sm:$0xf] }
  0x14   :  { %v1488_v58 = vor.u32 %v1872_v52, %v1485_v53  ;;  %v1838_v60 = vld [vmem:[#allocation3 + $0x4c] sm:$0xf0]  ;;  %v1836_v61 = vld [vmem:[#allocation3 + $0x44] sm:$0xf]  ;;  %v1484_v62 = vor.u32 %v1874_v55, %v1483_v54  ;;  %v1341_v63 = vld [vmem:[#allocation3 + $0x50] sm:$0xf0] }
  0x15   :  { %461 = vmatpush.bf16.msra.mxu0 %v1372_v44  ;;  %v1868_v0 = vld [vmem:[#allocation3 + $0x144] sm:$0xf]  ;;  %v1469_v1 = vld [vmem:[#allocation3 + $0x150] sm:$0xf0]  ;;  %v1467_v2 = vld [vmem:[#allocation3 + $0x140] sm:$0xf]  ;;  %v1340_v4 = vor.u32 %v1838_v60, %v1339_v59  ;;  %v1344_v5 = vor.u32 %v1836_v61, %v1341_v63 }
  0x16   :  { %487 = vmatpush.bf16.msra.mxu2 %v1376_v45  ;;  %v1870_v3 = vld [vmem:[#allocation3 + $0x14c] sm:$0xf0]  ;;  %v1472_v6 = vor.u32 %v1868_v0, %v1469_v1  ;;  %v1323_v7 = vld [vmem:[#allocation3 + $0x20] sm:$0xf]  ;;  %v1832_v9 = vld [vmem:[#allocation3 + $0x24] sm:$0xf] }
  0x17   :  { %500 = vmatpush.bf16.msra.mxu3 %v1504_v46  ;;  %474 = vmatpush.bf16.msra.mxu1 %v1500_v50  ;;  %v1834_v8 = vld [vmem:[#allocation3 + $0x2c] sm:$0xf0]  ;;  %v1468_v10 = vor.u32 %v1870_v3, %v1467_v2  ;;  %v1325_v11 = vld [vmem:[#allocation3 + $0x30] sm:$0xf0]  ;;  %v1864_v12 = vld [vmem:[#allocation3 + $0x124] sm:$0xf] }
  0x18   :  { %v1453_v13 = vld [vmem:[#allocation3 + $0x130] sm:$0xf0]  ;;  %v1451_v14 = vld [vmem:[#allocation3 + $0x120] sm:$0xf]  ;;  %v1866_v15 = vld [vmem:[#allocation3 + $0x12c] sm:$0xf0]  ;;  %v1324_v17 = vor.u32 %v1834_v8, %v1323_v7  ;;  %v1328_v21 = vor.u32 %v1832_v9, %v1325_v11 }
  0x19   :  { %462 = vmatpush.bf16.msra.mxu0 %v1356_v56  ;;  %v1307_v16 = vld [vmem:[#allocation3] sm:$0xf]  ;;  %v1830_v18 = vld [vmem:[#allocation3 + $0xc] sm:$0xf0]  ;;  %v1456_v22 = vor.u32 %v1864_v12, %v1453_v13  ;;  %v1828_v23 = vld [vmem:[#allocation3 + $0x4] sm:$0xf]  ;;  %v1452_v27 = vor.u32 %v1866_v15, %v1451_v14 }
  0x1a   :  { %488 = vmatpush.bf16.msra.mxu2 %v1360_v57  ;;  %v49_v19 = vld [vmem:[%s2272_s0] sm:$0xff]  ;;  %v1309_v24 = vld [vmem:[#allocation3 + $0x10] sm:$0xf0]  ;;  %v1427_v29 = vld [vmem:[#allocation3 + $0xe8] sm:$0xf]  ;;  %v1308_v34 = vor.u32 %v1830_v18, %v1307_v16  ;;  %s2059_s25 = smov [#allocation6]  }
  0x1b   :  { %501 = vmatpush.bf16.msra.mxu3 %v1488_v58  ;;  %475 = vmatpush.bf16.msra.mxu1 %v1484_v62  ;;  %v52_v20 = vld [vmem:[%s2273_s1] sm:$0xff]  ;;  %v1437_v28 = vld [vmem:[#allocation3 + $0x110] sm:$0xf0]  ;;  %v1859_v30 = vld [vmem:[#allocation3 + $0xf4] sm:$0xf0]  ;;  %v1312_v39 = vor.u32 %v1828_v23, %v1309_v24  ;;  %s1285_s26 = sshll.u32 %s2059_s25, 4  ;;  %s1286_s26 = int_to_ptr.vmem [resolvable:$true] %s1285_s26 }
  0x1c   :  { %v1860_v25 = vld [vmem:[#allocation3 + $0x104] sm:$0xf]  ;;  %v1959_v26 = vpack.c.bf16 %v52_v20, %v49_v19  ;;  %v1857_v31 = vld [vmem:[#allocation3 + $0xec] sm:$0xf]  ;;  %v1429_v32 = vld [vmem:[#allocation3 + $0xf8] sm:$0xf0]  ;;  %v1428_v44 = vor.u32 %v1859_v30, %v1427_v29 }
  0x1d   :  { %463 = vmatpush.bf16.msra.mxu0 %v1340_v4  ;;  %v1889_v33 = vld [vmem:[#allocation3 + $0x1ec] sm:$0xf]  ;;  %v1557_v35 = vld [vmem:[#allocation3 + $0x1f8] sm:$0xf0]  ;;  %v1435_v36 = vld [vmem:[#allocation3 + $0x100] sm:$0xf]  ;;  %v1440_v40 = vor.u32 %v1860_v25, %v1437_v28  ;;  %v1432_v45 = vor.u32 %v1857_v31, %v1429_v32 }
  0x1e   :  { %489 = vmatpush.bf16.msra.mxu2 %v1344_v5  ;;  %v1862_v37 = vld [vmem:[#allocation3 + $0x10c] sm:$0xf0]  ;;  %v132_v38 = vunpack.c.l.b16 %v1959_v26  ;;  %v1555_v41 = vld [vmem:[#allocation3 + $0x1e8] sm:$0xf]  ;;  %v1891_v42 = vld [vmem:[#allocation3 + $0x1f4] sm:$0xf0]  ;;  %v133_v43 = vunpack.c.h.b16 %v1959_v26  ;;  %v1560_v47 = vor.u32 %v1889_v33, %v1557_v35 }
  0x1f   :  { %502 = vmatpush.bf16.msra.mxu3 %v1472_v6  ;;  %476 = vmatpush.bf16.msra.mxu1 %v1468_v10  ;;  %v1411_v46 = vld [vmem:[#allocation3 + $0xc8] sm:$0xf]  ;;  %v1436_v48 = vor.u32 %v1862_v37, %v1435_v36  ;;  %v1855_v49 = vld [vmem:[#allocation3 + $0xd4] sm:$0xf0]  ;;  %v1853_v50 = vld [vmem:[#allocation3 + $0xcc] sm:$0xf]  ;;  %v1556_v53 = vor.u32 %v1891_v42, %v1555_v41 }
  0x20   :  { %v1413_v51 = vld [vmem:[#allocation3 + $0xd8] sm:$0xf0]  ;;  %v2124_v52 = vpack.c.b16 %v132_v38, %v132_v38  ;;  %v1885_v54 = vld [vmem:[#allocation3 + $0x1cc] sm:$0xf]  ;;  %v2126_v56 = vpack.c.b16 %v133_v43, %v133_v43  ;;  %v1539_v57 = vld [vmem:[#allocation3 + $0x1c8] sm:$0xf]  ;;  %v1412_v59 = vor.u32 %v1855_v49, %v1411_v46 }
  0x21   :  { %464 = vmatpush.bf16.msra.mxu0 %v1324_v17  ;;  %v1541_v55 = vld [vmem:[#allocation3 + $0x1d8] sm:$0xf0]  ;;  %v1887_v58 = vld [vmem:[#allocation3 + $0x1d4] sm:$0xf0]  ;;  %v1416_v60 = vor.u32 %v1853_v50, %v1413_v51  ;;  %v1395_v61 = vld [vmem:[#allocation3 + $0xa8] sm:$0xf] }
  0x22   :  { %490 = vmatpush.bf16.msra.mxu2 %v1328_v21  ;;  %v1544_v62 = vor.u32 %v1885_v54, %v1541_v55  ;;  %v1851_v63 = vld [vmem:[#allocation3 + $0xb4] sm:$0xf0]  ;;  %v1849_v0 = vld [vmem:[#allocation3 + $0xac] sm:$0xf]  ;;  %v1397_v1 = vld [vmem:[#allocation3 + $0xb8] sm:$0xf0]  ;;  %v1540_v2 = vor.u32 %v1887_v58, %v1539_v57 }
  0x23   :  { %503 = vmatpush.bf16.msra.mxu3 %v1456_v22  ;;  %477 = vmatpush.bf16.msra.mxu1 %v1452_v27  ;;  %v1881_v3 = vld [vmem:[#allocation3 + $0x1ac] sm:$0xf]  ;;  %v1525_v4 = vld [vmem:[#allocation3 + $0x1b8] sm:$0xf0]  ;;  %v1523_v5 = vld [vmem:[#allocation3 + $0x1a8] sm:$0xf]  ;;  %v1396_v7 = vor.u32 %v1851_v63, %v1395_v61  ;;  %v1400_v8 = vor.u32 %v1849_v0, %v1397_v1 }
  0x24   :  { %v1883_v6 = vld [vmem:[#allocation3 + $0x1b4] sm:$0xf0]  ;;  %v1379_v9 = vld [vmem:[#allocation3 + $0x88] sm:$0xf]  ;;  %v1528_v10 = vor.u32 %v1881_v3, %v1525_v4  ;;  %v1845_v12 = vld [vmem:[#allocation3 + $0x8c] sm:$0xf] }
  0x25   :  { %465 = vmatpush.bf16.msra.mxu0 %v1308_v34  ;;  %v1847_v11 = vld [vmem:[#allocation3 + $0x94] sm:$0xf0]  ;;  %v1381_v13 = vld [vmem:[#allocation3 + $0x98] sm:$0xf0]  ;;  %v1524_v14 = vor.u32 %v1883_v6, %v1523_v5  ;;  %v1877_v15 = vld [vmem:[#allocation3 + $0x18c] sm:$0xf] }
  0x26   :  { %491 = vmatpush.bf16.msra.mxu2 %v1312_v39  ;;  %v1509_v16 = vld [vmem:[#allocation3 + $0x198] sm:$0xf0]  ;;  %v1507_v17 = vld [vmem:[#allocation3 + $0x188] sm:$0xf]  ;;  %v1879_v18 = vld [vmem:[#allocation3 + $0x194] sm:$0xf0]  ;;  %v1380_v19 = vor.u32 %v1847_v11, %v1379_v9  ;;  %v1384_v20 = vor.u32 %v1845_v12, %v1381_v13 }
  0x27   :  { %504 = vmatpush.bf16.msra.mxu3 %v1440_v40  ;;  %478 = vmatpush.bf16.msra.mxu1 %v1436_v48  ;;  %v1363_v21 = vld [vmem:[#allocation3 + $0x68] sm:$0xf]  ;;  %v1512_v22 = vor.u32 %v1877_v15, %v1509_v16  ;;  %v1843_v23 = vld [vmem:[#allocation3 + $0x74] sm:$0xf0]  ;;  %v1841_v24 = vld [vmem:[#allocation3 + $0x6c] sm:$0xf]  ;;  %v1508_v26 = vor.u32 %v1879_v18, %v1507_v17 }
  0x28   :  { %466 = vmatmul.bf16.vlgmr.msra.gmra.mxu0 %v2124_v52  ;;  %v1365_v25 = vld [vmem:[#allocation3 + $0x78] sm:$0xf0]  ;;  %v1873_v27 = vld [vmem:[#allocation3 + $0x16c] sm:$0xf]  ;;  %v1491_v29 = vld [vmem:[#allocation3 + $0x168] sm:$0xf]  ;;  %v1364_v31 = vor.u32 %v1843_v23, %v1363_v21 }
  0x29   :  { %510 = vmatpush.bf16.msrb.mxu0 %v1428_v44  ;;  %492 = vmatmul.bf16.vlgmr.msra.gmra.mxu2 %v2124_v52  ;;  %v1493_v28 = vld [vmem:[#allocation3 + $0x178] sm:$0xf0]  ;;  %v1875_v30 = vld [vmem:[#allocation3 + $0x174] sm:$0xf0]  ;;  %v1368_v32 = vor.u32 %v1841_v24, %v1365_v25  ;;  %v1347_v33 = vld [vmem:[#allocation3 + $0x48] sm:$0xf] }
  0x2a   :  { %536 = vmatpush.bf16.msrb.mxu2 %v1432_v45  ;;  %505 = vmatmul.bf16.vlgmr.msra.gmra.mxu3 %v2126_v56  ;;  %v1496_v34 = vor.u32 %v1873_v27, %v1493_v28  ;;  %v1839_v35 = vld [vmem:[#allocation3 + $0x54] sm:$0xf0]  ;;  %v1837_v36 = vld [vmem:[#allocation3 + $0x4c] sm:$0xf]  ;;  %v1349_v37 = vld [vmem:[#allocation3 + $0x58] sm:$0xf0]  ;;  %v1492_v38 = vor.u32 %v1875_v30, %v1491_v29 }
  0x2b   :  { %549 = vmatpush.bf16.msrb.mxu3 %v1560_v47  ;;  %523 = vmatpush.bf16.msrb.mxu1 %v1556_v53  ;;  %v1869_v39 = vld [vmem:[#allocation3 + $0x14c] sm:$0xf]  ;;  %v1477_v40 = vld [vmem:[#allocation3 + $0x158] sm:$0xf0]  ;;  %v1475_v41 = vld [vmem:[#allocation3 + $0x148] sm:$0xf]  ;;  %v1348_v43 = vor.u32 %v1839_v35, %v1347_v33  ;;  %v1352_v44 = vor.u32 %v1837_v36, %v1349_v37 }
  0x2c   :  { %479 = vmatmul.bf16.vlgmr.msra.gmra.mxu1 %v2126_v56  ;;  %v1871_v42 = vld [vmem:[#allocation3 + $0x154] sm:$0xf0]  ;;  %v1331_v45 = vld [vmem:[#allocation3 + $0x28] sm:$0xf]  ;;  %v1480_v46 = vor.u32 %v1869_v39, %v1477_v40  ;;  %v1833_v48 = vld [vmem:[#allocation3 + $0x2c] sm:$0xf] }
  0x2d   :  { %511 = vmatpush.bf16.msrb.mxu0 %v1412_v59  ;;  %v1835_v47 = vld [vmem:[#allocation3 + $0x34] sm:$0xf0]  ;;  %v1333_v49 = vld [vmem:[#allocation3 + $0x38] sm:$0xf0]  ;;  %v1476_v50 = vor.u32 %v1871_v42, %v1475_v41  ;;  %v1865_v51 = vld [vmem:[#allocation3 + $0x12c] sm:$0xf] }
  0x2e   :  { %537 = vmatpush.bf16.msrb.mxu2 %v1416_v60  ;;  %v1461_v53 = vld [vmem:[#allocation3 + $0x138] sm:$0xf0]  ;;  %v1459_v54 = vld [vmem:[#allocation3 + $0x128] sm:$0xf]  ;;  %v1867_v55 = vld [vmem:[#allocation3 + $0x134] sm:$0xf0]  ;;  %v1332_v57 = vor.u32 %v1835_v47, %v1331_v45  ;;  %v1336_v58 = vor.u32 %v1833_v48, %v1333_v49 }
  0x2f   :  { %550 = vmatpush.bf16.msrb.mxu3 %v1544_v62  ;;  %524 = vmatpush.bf16.msrb.mxu1 %v1540_v2  ;;  %v1315_v59 = vld [vmem:[#allocation3 + $0x8] sm:$0xf]  ;;  %v1464_v60 = vor.u32 %v1865_v51, %v1461_v53  ;;  %v1831_v61 = vld [vmem:[#allocation3 + $0x14] sm:$0xf0]  ;;  %v1829_v62 = vld [vmem:[#allocation3 + $0xc] sm:$0xf]  ;;  %v1460_v0 = vor.u32 %v1867_v55, %v1459_v54 }
  0x30   :  { %v1317_v63 = vld [vmem:[#allocation3 + $0x18] sm:$0xf0]  ;;  %v1861_v1 = vld [vmem:[#allocation3 + $0x10c] sm:$0xf]  ;;  %v1443_v3 = vld [vmem:[#allocation3 + $0x108] sm:$0xf]  ;;  %v1316_v5 = vor.u32 %v1831_v61, %v1315_v59 }
  0x31   :  { %512 = vmatpush.bf16.msrb.mxu0 %v1396_v7  ;;  %v1445_v2 = vld [vmem:[#allocation3 + $0x118] sm:$0xf0]  ;;  %v1863_v4 = vld [vmem:[#allocation3 + $0x114] sm:$0xf0]  ;;  %v1320_v6 = vor.u32 %v1829_v62, %v1317_v63  ;;  %v2139_v9 = vld [vmem:[%s2276_s4] sm:$0xf] }
  0x32   :  { %538 = vmatpush.bf16.msrb.mxu2 %v1400_v8  ;;  %v1448_v7 = vor.u32 %v1861_v1, %v1445_v2  ;;  %v1444_v8 = vor.u32 %v1863_v4, %v1443_v3  ;;  %v1681_v11 = vld [vmem:[#allocation3 + $0x2e0] sm:$0xf]  ;;  %v1922_v12 = vld [vmem:[#allocation3 + $0x2ec] sm:$0xf0]  ;;  %v1920_v16 = vld [vmem:[#allocation3 + $0x2e4] sm:$0xf] }
  0x33   :  { %551 = vmatpush.bf16.msrb.mxu3 %v1528_v10  ;;  %525 = vmatpush.bf16.msrb.mxu1 %v1524_v14  ;;  %v123_v10 = vperm.slane %v2139_v9, 0  ;;  %v1809_v13 = vld [vmem:[#allocation3 + $0x3e0] sm:$0xf]  ;;  %v1682_v14 = vor.u32 %v1922_v12, %v1681_v11  ;;  %v1954_v15 = vld [vmem:[#allocation3 + $0x3ec] sm:$0xf0]  ;;  %s1287_s29 = sshll.u32 %s2280_s8, 4  ;;  %s1288_s29 = int_to_ptr.hbm [resolvable:$true] %s1287_s29 }
  0x34   :  { %v1683_v17 = vld [vmem:[#allocation3 + $0x2f0] sm:$0xf0]  ;;  %v1810_v18 = vor.u32 %v1954_v15, %v1809_v13  ;;  %v1665_v23 = vld [vmem:[#allocation3 + $0x2c0] sm:$0xf]  ;;  %v1918_v24 = vld [vmem:[#allocation3 + $0x2cc] sm:$0xf0] }
  0x35   :  { %513 = vmatpush.bf16.msrb.mxu0 %v1380_v19  ;;  %v1952_v19 = vld [vmem:[#allocation3 + $0x3e4] sm:$0xf]  ;;  %v1793_v25 = vld [vmem:[#allocation3 + $0x3c0] sm:$0xf]  ;;  %v1666_v28 = vor.u32 %v1918_v24, %v1665_v23  ;;  %v1950_v29 = vld [vmem:[#allocation3 + $0x3cc] sm:$0xf0] }
  0x36   :  { %539 = vmatpush.bf16.msrb.mxu2 %v1384_v20  ;;  %v1811_v20 = vld [vmem:[#allocation3 + $0x3f0] sm:$0xf0]  ;;  %v1916_v30 = vld [vmem:[#allocation3 + $0x2c4] sm:$0xf]  ;;  %v1649_v40 = vld [vmem:[#allocation3 + $0x2a0] sm:$0xf] }
  0x37   :  { %552 = vmatpush.bf16.msrb.mxu3 %v1512_v22  ;;  %526 = vmatpush.bf16.msrb.mxu1 %v1508_v26  ;;  %v124_v26 = vperm.slane %v2139_v9, 1  ;;  %v1667_v33 = vld [vmem:[#allocation3 + $0x2d0] sm:$0xf0]  ;;  %v1914_v41 = vld [vmem:[#allocation3 + $0x2ac] sm:$0xf0] }
  0x38   :  { %v1795_v35 = vld [vmem:[#allocation3 + $0x3d0] sm:$0xf0]  ;;  %v1670_v36 = vor.u32 %v1916_v30, %v1667_v33  ;;  %v1777_v45 = vld [vmem:[#allocation3 + $0x3a0] sm:$0xf]  ;;  %v1912_v47 = vld [vmem:[#allocation3 + $0x2a4] sm:$0xf] }
  0x39   :  { %514 = vmatpush.bf16.msrb.mxu0 %v1364_v31  ;;  %v1651_v49 = vld [vmem:[#allocation3 + $0x2b0] sm:$0xf0]  ;;  %v1910_v59 = vld [vmem:[#allocation3 + $0x28c] sm:$0xf0]  ;;  %v1908_v1 = vld [vmem:[#allocation3 + $0x284] sm:$0xf] }
  0x3a   :  { %540 = vmatpush.bf16.msrb.mxu2 %v1368_v32  ;;  %v1794_v32 = vor.u32 %v1950_v29, %v1793_v25  ;;  %v1779_v51 = vld [vmem:[#allocation3 + $0x3b0] sm:$0xf0]  ;;  %v1654_v55 = vor.u32 %v1912_v47, %v1651_v49  ;;  %v1940_v4 = vld [vmem:[#allocation3 + $0x384] sm:$0xf]  ;;  %v1617_v11 = vld [vmem:[#allocation3 + $0x260] sm:$0xf] }
  0x3b   :  { %553 = vmatpush.bf16.msrb.mxu3 %v1496_v34  ;;  %527 = vmatpush.bf16.msrb.mxu1 %v1492_v38  ;;  %v1948_v34 = vld [vmem:[#allocation3 + $0x3c4] sm:$0xf]  ;;  %v1635_v3 = vld [vmem:[#allocation3 + $0x290] sm:$0xf0]  ;;  %v1906_v12 = vld [vmem:[#allocation3 + $0x26c] sm:$0xf0] }
  0x3c   :  { %v1798_v37 = vor.u32 %v1948_v34, %v1795_v35  ;;  %v1745_v13 = vld [vmem:[#allocation3 + $0x360] sm:$0xf]  ;;  %v1902_v24 = vld [vmem:[#allocation3 + $0x24c] sm:$0xf0]  ;;  %v1900_v29 = vld [vmem:[#allocation3 + $0x244] sm:$0xf] }
  0x3d   :  { %515 = vmatpush.bf16.msrb.mxu0 %v1348_v43  ;;  %v1601_v23 = vld [vmem:[#allocation3 + $0x240] sm:$0xf]  ;;  %v1932_v33 = vld [vmem:[#allocation3 + $0x344] sm:$0xf]  ;;  %v1731_v35 = vld [vmem:[#allocation3 + $0x350] sm:$0xf0] }
  0x3e   :  { %541 = vmatpush.bf16.msrb.mxu2 %v1352_v44  ;;  %v1650_v44 = vor.u32 %v1914_v41, %v1649_v40  ;;  %v1729_v25 = vld [vmem:[#allocation3 + $0x340] sm:$0xf]  ;;  %v1734_v40 = vor.u32 %v1932_v33, %v1731_v35  ;;  %v1898_v41 = vld [vmem:[#allocation3 + $0x22c] sm:$0xf0]  ;;  %v1896_v47 = vld [vmem:[#allocation3 + $0x224] sm:$0xf] }
  0x3f   :  { %554 = vmatpush.bf16.msrb.mxu3 %v1480_v46  ;;  %528 = vmatpush.bf16.msrb.mxu1 %v1476_v50  ;;  %v1946_v46 = vld [vmem:[#allocation3 + $0x3ac] sm:$0xf0]  ;;  %v1944_v50 = vld [vmem:[#allocation3 + $0x3a4] sm:$0xf]  ;;  %v1673_v33 = vld [vmem:[#allocation3 + $0x2c8] sm:$0xf] }
  0x40   :  { %v1778_v48 = vor.u32 %v1946_v46, %v1777_v45  ;;  %v126_v46 = vperm.slane %v2139_v9, 3 }
  0x41   :  { %516 = vmatpush.bf16.msrb.mxu0 %v1332_v57  ;;  %v1782_v57 = vor.u32 %v1944_v50, %v1779_v51 }
  0x42   :  { %542 = vmatpush.bf16.msrb.mxu2 %v1336_v58  ;;  %v1633_v58 = vld [vmem:[#allocation3 + $0x280] sm:$0xf] }
  0x43   :  { %555 = vmatpush.bf16.msrb.mxu3 %v1464_v60  ;;  %529 = vmatpush.bf16.msrb.mxu1 %v1460_v0  ;;  %v1761_v60 = vld [vmem:[#allocation3 + $0x380] sm:$0xf]  ;;  %v1634_v63 = vor.u32 %v1910_v59, %v1633_v58  ;;  %v1942_v0 = vld [vmem:[#allocation3 + $0x38c] sm:$0xf0] }
  0x44   :  { %v1762_v2 = vor.u32 %v1942_v0, %v1761_v60  ;;  %v1569_v60 = vld [vmem:[#allocation3 + $0x200] sm:$0xf] }
  0x45   :  { %517 = vmatpush.bf16.msrb.mxu0 %v1316_v5  ;;  %v1763_v5 = vld [vmem:[#allocation3 + $0x390] sm:$0xf0]  ;;  %v1697_v0 = vld [vmem:[#allocation3 + $0x300] sm:$0xf] }
  0x46   :  { %543 = vmatpush.bf16.msrb.mxu2 %v1320_v6  ;;  %v1638_v6 = vor.u32 %v1908_v1, %v1635_v3  ;;  %v1926_v1 = vld [vmem:[#allocation3 + $0x30c] sm:$0xf0] }
  0x47   :  { %556 = vmatpush.bf16.msrb.mxu3 %v1448_v7  ;;  %530 = vmatpush.bf16.msrb.mxu1 %v1444_v8  ;;  %v1766_v7 = vor.u32 %v1940_v4, %v1763_v5  ;;  %v1698_v5 = vor.u32 %v1926_v1, %v1697_v0 }
  0x48   :  { %518 = vmatmul.bf16.vlgmr.msrb.gmra.mxu0 %v2124_v52 }
  0x49   :  { %544 = vmatmul.bf16.vlgmr.msrb.gmra.mxu2 %v2124_v52  ;;  %v1686_v52 = vor.u32 %v1920_v16, %v1683_v17  ;;  %1039 = vmatpush.bf16.msra.mxu0 %v1682_v14  ;;  %v1618_v16 = vor.u32 %v1906_v12, %v1617_v11  ;;  %v1938_v17 = vld [vmem:[#allocation3 + $0x36c] sm:$0xf0] }
  0x4a   :  { %557 = vmatmul.bf16.vlgmr.msrb.gmra.mxu3 %v2126_v56  ;;  %531 = vmatmul.bf16.vlgmr.msrb.gmra.mxu1 %v2126_v56  ;;  %v1814_v56 = vor.u32 %v1952_v19, %v1811_v20  ;;  %v1619_v19 = vld [vmem:[#allocation3 + $0x270] sm:$0xf0]  ;;  %v1936_v20 = vld [vmem:[#allocation3 + $0x364] sm:$0xf] }
  0x4b   :  { %1052 = vmatpush.bf16.msra.mxu1 %v1810_v18  ;;  %1065 = vmatpush.bf16.msra.mxu2 %v1686_v52  ;;  %v1904_v18 = vld [vmem:[#allocation3 + $0x264] sm:$0xf]  ;;  %v1746_v52 = vor.u32 %v1938_v17, %v1745_v13  ;;  %v1817_v17 = vld [vmem:[#allocation3 + $0x3e8] sm:$0xf] }
  0x4c   :  { %1078 = vmatpush.bf16.msra.mxu3 %v1814_v56  ;;  %v1622_v56 = vor.u32 %v1904_v18, %v1619_v19 }
  0x4d   :  { %1040 = vmatpush.bf16.msra.mxu0 %v1666_v28  ;;  %v1934_v28 = vld [vmem:[#allocation3 + $0x34c] sm:$0xf0] }
  0x4f   :  { %1053 = vmatpush.bf16.msra.mxu1 %v1794_v32  ;;  %1066 = vmatpush.bf16.msra.mxu2 %v1670_v36  ;;  %v1603_v32 = vld [vmem:[#allocation3 + $0x250] sm:$0xf0]  ;;  %v125_v36 = vperm.slane %v2139_v9, 2  ;;  %v121_v9 = vld [vmem:[%s2274_s2] sm:$0xff] }
  0x50   :  { %1079 = vmatpush.bf16.msra.mxu3 %v1798_v37  ;;  %v1606_v34 = vor.u32 %v1900_v29, %v1603_v32  ;;  %v1953_v29 = vld [vmem:[#allocation3 + $0x3ec] sm:$0xf]  ;;  %v1819_v32 = vld [vmem:[#allocation3 + $0x3f8] sm:$0xf0] }
  0x51   :  { %1041 = vmatpush.bf16.msra.mxu0 %v1650_v44 }
  0x53   :  { %1054 = vmatpush.bf16.msra.mxu1 %v1778_v48  ;;  %1067 = vmatpush.bf16.msra.mxu2 %v1654_v55  ;;  %v1587_v48 = vld [vmem:[#allocation3 + $0x230] sm:$0xf0] }
  0x54   :  { %1080 = vmatpush.bf16.msra.mxu3 %v1782_v57  ;;  %v1715_v55 = vld [vmem:[#allocation3 + $0x330] sm:$0xf0] }
  0x55   :  { %1042 = vmatpush.bf16.msra.mxu0 %v1634_v63 }
  0x57   :  { %1055 = vmatpush.bf16.msra.mxu1 %v1762_v2  ;;  %1068 = vmatpush.bf16.msra.mxu2 %v1638_v6  ;;  %v1892_v2 = vld [vmem:[#allocation3 + $0x204] sm:$0xf]  ;;  %v1571_v6 = vld [vmem:[#allocation3 + $0x210] sm:$0xf0] }
  0x58   :  { %1081 = vmatpush.bf16.msra.mxu3 %v1766_v7  ;;  %v1924_v7 = vld [vmem:[#allocation3 + $0x304] sm:$0xf]  ;;  %v1574_v12 = vor.u32 %v1892_v2, %v1571_v6  ;;  %v1945_v2 = vld [vmem:[#allocation3 + $0x3ac] sm:$0xf] }
  0x59   :  { %1043 = vmatpush.bf16.msra.mxu0 %v1618_v16  ;;  %v1923_v16 = vld [vmem:[#allocation3 + $0x2f4] sm:$0xf0] }
  0x5b   :  { %1056 = vmatpush.bf16.msra.mxu1 %v1746_v52  ;;  %1069 = vmatpush.bf16.msra.mxu2 %v1622_v56  ;;  %v1955_v56 = vld [vmem:[#allocation3 + $0x3f4] sm:$0xf0] }
  0x5f   :  { %1070 = vmatpush.bf16.msra.mxu2 %v1606_v34  ;;  %v1919_v34 = vld [vmem:[#allocation3 + $0x2d4] sm:$0xf0] }
  0xa5   :  { %v467_v21 = vpop.f32.mrf.mxu0 }
  0xa6   :  { %v468_v22 = vadd.f32 %v467_v21, %v123_v10  ;;  %v1747_v21 = vld [vmem:[#allocation3 + $0x370] sm:$0xf0] }
  0xa9   :  { %v480_v27 = vpop.f32.mrf.mxu1 }
  0xaa   :  { %v481_v31 = vadd.f32 %v480_v27, %v468_v22  ;;  %v1750_v22 = vor.u32 %v1936_v20, %v1747_v21  ;;  %v1602_v27 = vor.u32 %v1902_v24, %v1601_v23 }
  0xac   :  { %v493_v38 = vpop.f32.mrf.mxu2  ;;  %v1561_v39 = vmul.f32 -1.442695, %v481_v31  ;;  %1082 = vmatpush.bf16.msra.mxu3 %v1750_v22  ;;  %v1730_v31 = vor.u32 %v1934_v28, %v1729_v25  ;;  %1044 = vmatpush.bf16.msra.mxu0 %v1602_v27  ;;  %v1921_v22 = vld [vmem:[#allocation3 + $0x2ec] sm:$0xf]  ;;  %v1818_v27 = vor.u32 %v1955_v56, %v1817_v17  ;;  %v1691_v28 = vld [vmem:[#allocation3 + $0x2f8] sm:$0xf0] }
  0xad   :  { %v494_v42 = vadd.f32 %v493_v38, %v124_v26  ;;  %v506_v43 = vpop.f32.mrf.mxu3  ;;  %v469_v54 = vpop.f32.mrf.mxu0  ;;  %v1585_v38 = vld [vmem:[#allocation3 + $0x220] sm:$0xf]  ;;  %v1943_v17 = vld [vmem:[#allocation3 + $0x394] sm:$0xf0]  ;;  %v1771_v56 = vld [vmem:[#allocation3 + $0x398] sm:$0xf0] }
  0xae   :  { %1972 = vpow2.f32 %v1561_v39  ;;  %1057 = vmatpush.bf16.msra.mxu1 %v1730_v31  ;;  %v1586_v50 = vor.u32 %v1898_v41, %v1585_v38  ;;  %v1928_v54 = vld [vmem:[#allocation3 + $0x324] sm:$0xf]  ;;  %v1951_v38 = vld [vmem:[#allocation3 + $0x3d4] sm:$0xf0]  ;;  %v1674_v41 = vor.u32 %v1919_v34, %v1673_v33  ;;  %v1937_v34 = vld [vmem:[#allocation3 + $0x36c] sm:$0xf] }
  0xaf   :  { %v507_v53 = vadd.f32 %v506_v43, %v494_v42  ;;  %v1713_v42 = vld [vmem:[#allocation3 + $0x320] sm:$0xf]  ;;  %v1930_v43 = vld [vmem:[#allocation3 + $0x32c] sm:$0xf0]  ;;  %v1718_v59 = vor.u32 %v1928_v54, %v1715_v55  ;;  %v1915_v54 = vld [vmem:[#allocation3 + $0x2b4] sm:$0xf0] }
  0xb0   :  { %1083 = vmatpush.bf16.msra.mxu3 %v1734_v40  ;;  %v1714_v51 = vor.u32 %v1930_v43, %v1713_v42  ;;  %1045 = vmatpush.bf16.msra.mxu0 %v1586_v50  ;;  %v1917_v40 = vld [vmem:[#allocation3 + $0x2cc] sm:$0xf]  ;;  %v1675_v43 = vld [vmem:[#allocation3 + $0x2d8] sm:$0xf0]  ;;  %v1785_v55 = vld [vmem:[#allocation3 + $0x3a8] sm:$0xf] }
  0xb1   :  { %v1562_v61 = vmul.f32 -1.442695, %v507_v53  ;;  %v482_v62 = vpop.f32.mrf.mxu1  ;;  %v1590_v53 = vor.u32 %v1896_v47, %v1587_v48  ;;  %v1678_v50 = vor.u32 %v1917_v40, %v1675_v43  ;;  %v1737_v40 = vld [vmem:[#allocation3 + $0x348] sm:$0xf]  ;;  %v1901_v43 = vld [vmem:[#allocation3 + $0x24c] sm:$0xf] }
  0xb2   :  { %1058 = vmatpush.bf16.msra.mxu1 %v1714_v51  ;;  %v1909_v62 = vld [vmem:[#allocation3 + $0x28c] sm:$0xf] }
  0xb3   :  { %1974 = vpow2.f32 %v1562_v61  ;;  %v1894_v61 = vld [vmem:[#allocation3 + $0x20c] sm:$0xf0]  ;;  %1071 = vmatpush.bf16.msra.mxu2 %v1590_v53  ;;  %v1657_v53 = vld [vmem:[#allocation3 + $0x2a8] sm:$0xf] }
  0xb4   :  { %v1973_v8 = vpop.eup %1972  ;;  %v495_v10 = vpop.f32.mrf.mxu2  ;;  %v1570_v63 = vor.u32 %v1894_v61, %v1569_v60  ;;  %1084 = vmatpush.bf16.msra.mxu3 %v1718_v59  ;;  %v1658_v59 = vor.u32 %v1915_v54, %v1657_v53  ;;  %v1947_v60 = vld [vmem:[#allocation3 + $0x3b4] sm:$0xf0]  ;;  %v1913_v61 = vld [vmem:[#allocation3 + $0x2ac] sm:$0xf]  ;;  %v1593_v53 = vld [vmem:[#allocation3 + $0x228] sm:$0xf] }
  0xb5   :  { %v2143_v14 = vadd.f32 1.0, %v1973_v8  ;;  %v508_v15 = vpop.f32.mrf.mxu3  ;;  %v1699_v8 = vld [vmem:[#allocation3 + $0x310] sm:$0xf0]  ;;  %v1786_v1 = vor.u32 %v1947_v60, %v1785_v55  ;;  %v1899_v54 = vld [vmem:[#allocation3 + $0x234] sm:$0xf0] }
  0xb6   :  { %v1702_v13 = vor.u32 %v1924_v7, %v1699_v8  ;;  %v1689_v15 = vld [vmem:[#allocation3 + $0x2e8] sm:$0xf]  ;;  %1046 = vmatpush.bf16.msra.mxu0 %v1570_v63  ;;  %1059 = vmatpush.bf16.msra.mxu1 %v1698_v5  ;;  %v1659_v63 = vld [vmem:[#allocation3 + $0x2b8] sm:$0xf0]  ;;  %v1897_v60 = vld [vmem:[#allocation3 + $0x22c] sm:$0xf] }
  0xb7   :  { %1976 = vrcp.f32 %v2143_v14  ;;  %v575_v37 = vand.u32 2147483647, %v2143_v14  ;;  %v577_v45 = vand.u32 2147483648, %v2143_v14  ;;  %vm571_vm0 = vweird.f32 %v2143_v14  ;;  %1072 = vmatpush.bf16.msra.mxu2 %v1574_v12  ;;  %v1769_v12 = vld [vmem:[#allocation3 + $0x388] sm:$0xf] }
  0xb8   :  { %v1690_v21 = vor.u32 %v1923_v16, %v1689_v15  ;;  %1085 = vmatpush.bf16.msra.mxu3 %v1702_v13  ;;  %v1662_v7 = vor.u32 %v1913_v61, %v1659_v63  ;;  %v1595_v61 = vld [vmem:[#allocation3 + $0x238] sm:$0xf0]  ;;  %v1594_v63 = vor.u32 %v1899_v54, %v1593_v53 }
  0xb9   :  { %v1975_v26 = vpop.eup %1974  ;;  %vm2161_vm2 = vcmp.eq.f32.partialorder %v575_v37, 8.507059e+37  ;;  %v578_v20 = vor.u32 1.1754944e-38, %v577_v45  ;;  %v1801_v37 = vld [vmem:[#allocation3 + $0x3c8] sm:$0xf]  ;;  %v1803_v45 = vld [vmem:[#allocation3 + $0x3d8] sm:$0xf0] }
  0xba   :  { %v2146_v30 = vadd.f32 1.0, %v1975_v26  ;;  %1091 = vmatpush.bf16.msrb.mxu0 %v1690_v21  ;;  %1104 = vmatpush.bf16.msrb.mxu1 %v1818_v27  ;;  %v1802_v42 = vor.u32 %v1951_v38, %v1801_v37  ;;  %v1941_v21 = vld [vmem:[#allocation3 + $0x38c] sm:$0xf]  ;;  %v1907_v26 = vld [vmem:[#allocation3 + $0x274] sm:$0xf0] }
  0xbb   :  { %v1753_v27 = vld [vmem:[#allocation3 + $0x368] sm:$0xf]  ;;  %v1903_v38 = vld [vmem:[#allocation3 + $0x254] sm:$0xf0] }
  0xbc   :  { %1978 = vrcp.f32 %v2146_v30  ;;  %v594_v49 = vand.u32 2147483647, %v2146_v30  ;;  %v596_v57 = vand.u32 2147483648, %v2146_v30  ;;  %vm590_vm3 = vweird.f32 %v2146_v30 }
  0xbd   :  { %v2151_v39 = vpop.eup %1976 }
  0xbe   :  { %v567_v44 = vmul.f32 %v2151_v39, %v2143_v14  ;;  %vm572_vm1 = vweird.f32 %v2151_v39  ;;  %v2172_v18 = vor.u32 1.1754944e-38, %v596_v57  ;;  %vm2191_vm7 = vcmp.eq.f32.partialorder %v594_v49, 8.507059e+37  ;;  %1092 = vmatpush.bf16.msrb.mxu0 %v1674_v41  ;;  %1105 = vmatpush.bf16.msrb.mxu1 %v1802_v42  ;;  %v1935_v41 = vld [vmem:[#allocation3 + $0x354] sm:$0xf0] }
  0xbf   :  { %vm2178_vm5 = vmor %vm571_vm0, %vm572_vm1 }
  0xc0   :  { %v568_v58 = vsub.f32 1.0, %v567_v44  ;;  %v1949_v44 = vld [vmem:[#allocation3 + $0x3cc] sm:$0xf] }
  0xc1   :  { %v1806_v51 = vor.u32 %v1949_v44, %v1803_v45  ;;  %v1611_v44 = vld [vmem:[#allocation3 + $0x258] sm:$0xf0] }
  0xc2   :  { %v2165_v3 = vpop.eup %1978  ;;  %v569_v4 = vmul.f32 %v2151_v39, %v568_v58  ;;  %1093 = vmatpush.bf16.msrb.mxu0 %v1658_v59  ;;  %1106 = vmatpush.bf16.msrb.mxu1 %v1786_v1  ;;  %v1614_v55 = vor.u32 %v1901_v43, %v1611_v44  ;;  %v1214_v43 = vld [vmem:[%s2277_s5 + $0x10] sm:$0xff] }
  0xc3   :  { %v586_v10 = vmul.f32 %v2165_v3, %v2146_v30  ;;  %vm591_vm4 = vweird.f32 %v2165_v3  ;;  %v1694_v30 = vor.u32 %v1921_v22, %v1691_v28 }
  0xc4   :  { %vm2186_vm6 = vmor %vm590_vm3, %vm591_vm4  ;;  %v570_v14 = vadd.f32 %v2151_v39, %v569_v4  ;;  %v1787_v4 = vld [vmem:[#allocation3 + $0x3b8] sm:$0xf0] }
  0xc5   :  { %v519_v11 = vpop.f32.mrf.mxu0  ;;  %v587_v23 = vsub.f32 1.0, %v586_v10  ;;  %1117 = vmatpush.bf16.msrb.mxu2 %v1694_v30  ;;  %v1790_v8 = vor.u32 %v1945_v2, %v1787_v4  ;;  %v1641_v10 = vld [vmem:[#allocation3 + $0x288] sm:$0xf]  ;;  %v1905_v30 = vld [vmem:[#allocation3 + $0x26c] sm:$0xf] }
  0xc6   :  { %v520_v52 = vadd.f32 %v519_v11, %v125_v36  ;;  %v1822_v36 = vor.u32 %v1953_v29, %v1819_v32  ;;  %v574_v47 = vsel %vm2178_vm5, %v2151_v39, %v570_v14  ;;  %v1911_v11 = vld [vmem:[#allocation3 + $0x294] sm:$0xf0]  ;;  %v1625_v14 = vld [vmem:[#allocation3 + $0x268] sm:$0xf]  ;;  %v1627_v32 = vld [vmem:[#allocation3 + $0x278] sm:$0xf0] }
  0xc7   :  { %v532_v25 = vpop.f32.mrf.mxu1  ;;  %v588_v35 = vmul.f32 %v2165_v3, %v587_v23  ;;  %v1642_v16 = vor.u32 %v1911_v11, %v1641_v10  ;;  %v1626_v29 = vor.u32 %v1907_v26, %v1625_v14  ;;  %v1630_v37 = vor.u32 %v1905_v30, %v1627_v32  ;;  %v1577_v2 = vld [vmem:[#allocation3 + $0x208] sm:$0xf]  ;;  %v1895_v4 = vld [vmem:[#allocation3 + $0x214] sm:$0xf0]  ;;  %v1925_v10 = vld [vmem:[#allocation3 + $0x30c] sm:$0xf] }
  0xc8   :  { %v533_v31 = vadd.f32 %v532_v25, %v520_v52  ;;  %1130 = vmatpush.bf16.msrb.mxu3 %v1822_v36  ;;  %v1774_v25 = vor.u32 %v1941_v21, %v1771_v56  ;;  %v1609_v36 = vld [vmem:[#allocation3 + $0x248] sm:$0xf]  ;;  %v1707_v11 = vld [vmem:[#allocation3 + $0x318] sm:$0xf0] }
  0xc9   :  { %v589_v48 = vadd.f32 %v2165_v3, %v588_v35  ;;  %1118 = vmatpush.bf16.msrb.mxu2 %v1678_v50  ;;  %1094 = vmatpush.bf16.msrb.mxu0 %v1642_v16  ;;  %v1755_v35 = vld [vmem:[#allocation3 + $0x378] sm:$0xf0] }
  0xca   :  { %1980 = vtanh.f32 %v533_v31  ;;  %v1939_v31 = vld [vmem:[#allocation3 + $0x374] sm:$0xf0]  ;;  %v1758_v42 = vor.u32 %v1937_v34, %v1755_v35 }
  0xcb   :  { %v593_v39 = vsel %vm2186_vm6, %v2165_v3, %v589_v48  ;;  %v1754_v33 = vor.u32 %v1939_v31, %v1753_v27  ;;  %v1933_v48 = vld [vmem:[#allocation3 + $0x34c] sm:$0xf]  ;;  %v1215_v31 = vld [vmem:[%s2277_s5 + $0x18] sm:$0xff] }
  0xcc   :  { %v545_v49 = vpop.f32.mrf.mxu2  ;;  %v598_v5 = vsel %vm2191_vm7, %v2172_v18, %v593_v39  ;;  %1131 = vmatpush.bf16.msrb.mxu3 %v1806_v51  ;;  %v1643_v18 = vld [vmem:[#allocation3 + $0x298] sm:$0xf0]  ;;  %v1738_v51 = vor.u32 %v1935_v41, %v1737_v40  ;;  %v1929_v39 = vld [vmem:[#allocation3 + $0x32c] sm:$0xf]  ;;  %v1230_v30 = vunpack.c.2.s8 %v1215_v31  ;;  %v1231_v32 = vunpack.c.3.s8 %v1215_v31 }
  0xcd   :  { %v546_v57 = vadd.f32 %v545_v49, %v126_v46  ;;  %v558_v58 = vpop.f32.mrf.mxu3  ;;  %v521_v0 = vpop.f32.mrf.mxu0  ;;  %v579_v46 = vsel %vm2161_vm2, %v578_v20, %v574_v47  ;;  %v620_v52 = vmul.f32 %v598_v5, %v121_v9  ;;  %v1770_v20 = vor.u32 %v1943_v17, %v1769_v12  ;;  %1119 = vmatpush.bf16.msrb.mxu2 %v1662_v7  ;;  %v1739_v49 = vld [vmem:[#allocation3 + $0x358] sm:$0xf0]  ;;  %v1927_v5 = vld [vmem:[#allocation3 + $0x314] sm:$0xf0]  ;;  %v1893_v7 = vld [vmem:[#allocation3 + $0x20c] sm:$0xf] }
  0xce   :  { %v1646_v22 = vor.u32 %v1909_v62, %v1643_v18  ;;  %1095 = vmatpush.bf16.msrb.mxu0 %v1626_v29  ;;  %v1610_v47 = vor.u32 %v1903_v38, %v1609_v36  ;;  %v1742_v59 = vor.u32 %v1933_v48, %v1739_v49  ;;  %v1723_v0 = vld [vmem:[#allocation3 + $0x338] sm:$0xf0]  ;;  %v1598_v9 = vor.u32 %v1897_v60, %v1595_v61 }
  0xcf   :  { %v559_v6 = vadd.f32 %v558_v58, %v546_v57  ;;  %v534_v3 = vpop.f32.mrf.mxu1  ;;  %1107 = vmatpush.bf16.msrb.mxu1 %v1770_v20  ;;  %v1721_v57 = vld [vmem:[#allocation3 + $0x328] sm:$0xf]  ;;  %v1931_v58 = vld [vmem:[#allocation3 + $0x334] sm:$0xf0]  ;;  %v1710_v17 = vor.u32 %v1925_v10, %v1707_v11  ;;  %v1246_v34 = vcvt.s32.f32 %v1230_v30  ;;  %v1247_v35 = vcvt.s32.f32 %v1231_v32 }
  0xd0   :  { %v1981_v13 = vpop.eup %1980  ;;  %1132 = vmatpush.bf16.msrb.mxu3 %v1790_v8  ;;  %v1722_v1 = vor.u32 %v1931_v58, %v1721_v57  ;;  %v1579_v3 = vld [vmem:[#allocation3 + $0x218] sm:$0xf0]  ;;  %v1578_v8 = vor.u32 %v1895_v4, %v1577_v2  ;;  %v1229_v38 = vunpack.c.1.s8 %v1215_v31  ;;  %v1226_v48 = vunpack.c.2.s8 %v1214_v43 }
  0xd1   :  { %v1563_v15 = vmul.f32 -1.442695, %v559_v6  ;;  %v621_v19 = vmul.f32 %v1981_v13, %v579_v46  ;;  %1120 = vmatpush.bf16.msrb.mxu2 %v1646_v22  ;;  %v1705_v46 = vld [vmem:[#allocation3 + $0x308] sm:$0xf]  ;;  %v1726_v6 = vor.u32 %v1929_v39, %v1723_v0  ;;  %v1582_v16 = vor.u32 %v1893_v7, %v1579_v3 }
  0xd2   :  { %1096 = vmatpush.bf16.msrb.mxu0 %v1610_v47  ;;  %v1706_v13 = vor.u32 %v1927_v5, %v1705_v46  ;;  %v1255_v36 = vpack.c.bf16 %v1247_v35, %v1246_v34  ;;  %v1227_v49 = vunpack.c.3.s8 %v1214_v43  ;;  %v1224_v58 = vunpack.c.0.s8 %v1214_v43 }
  0xd3   :  { %1982 = vpow2.f32 %v1563_v15  ;;  %v2213_v23 = vadd.f32 %v621_v19, %v620_v52  ;;  %1108 = vmatpush.bf16.msrb.mxu1 %v1754_v33  ;;  %v2232_v33 = vld [vmem:[%s2276_s4 + $0x4] sm:$0xf] }
  0xd4   :  { %v547_v24 = vpop.f32.mrf.mxu2  ;;  %1133 = vmatpush.bf16.msrb.mxu3 %v1774_v25  ;;  %v1564_v25 = vld [vmem:[%s2273_s1 + $0x8] sm:$0xff]  ;;  %v704_v40 = vperm.slane %v2232_v33, 0  ;;  %v1243_v53 = vcvt.s32.f32 %v1227_v49  ;;  %v1240_v61 = vcvt.s32.f32 %v1224_v58  ;;  %v706_v32 = vperm.slane %v2232_v33, 2 }
  0xd5   :  { %v560_v28 = vpop.f32.mrf.mxu3  ;;  %626 = vst [vmem:[%s2282_s10] sm:$0xff] %v2213_v23  ;;  %1121 = vmatpush.bf16.msrb.mxu2 %v1630_v37  ;;  %v1228_v37 = vunpack.c.0.s8 %v1215_v31 }
  0xd6   :  { %1097 = vmatpush.bf16.msrb.mxu0 %v1594_v63 }
  0xd7   :  { %1109 = vmatpush.bf16.msrb.mxu1 %v1738_v51  ;;  %v1244_v41 = vcvt.s32.f32 %v1228_v37  ;;  %v1242_v51 = vcvt.s32.f32 %v1226_v48 }
  0xd8   :  { %1134 = vmatpush.bf16.msrb.mxu3 %v1758_v42  ;;  %v1245_v42 = vcvt.s32.f32 %v1229_v38 }
  0xd9   :  { %v1983_v45 = vpop.eup %1982  ;;  %1122 = vmatpush.bf16.msrb.mxu2 %v1614_v55  ;;  %v705_v55 = vperm.slane %v2232_v33, 1  ;;  %v1253_v57 = vpack.c.bf16 %v1243_v53, %v1242_v51 }
  0xda   :  { %v604_v50 = vadd.f32 1.0, %v1983_v45  ;;  %1098 = vmatpush.bf16.msrb.mxu0 %v1578_v8  ;;  %v1254_v47 = vpack.c.bf16 %v1245_v42, %v1244_v41 }
  0xdb   :  { %1110 = vmatpush.bf16.msrb.mxu1 %v1722_v1  ;;  %v1213_v1 = vld [vmem:[%s2277_s5 + $0x8] sm:$0xff] }
  0xdc   :  { %1984 = vrcp.f32 %v604_v50  ;;  %1135 = vmatpush.bf16.msrb.mxu3 %v1742_v59  ;;  %v616_v52 = vand.u32 2147483648, %v604_v50  ;;  %v614_v20 = vand.u32 2147483647, %v604_v50  ;;  %vm610_vm9 = vweird.f32 %v604_v50 }
  0xdd   :  { %1123 = vmatpush.bf16.msrb.mxu2 %v1598_v9  ;;  %1986 = vtanh.f32 %v2213_v23  ;;  %v1225_v59 = vunpack.c.1.s8 %v1214_v43  ;;  %v1222_v5 = vunpack.c.2.s8 %v1213_v1 }
  0xde   :  { %v617_v21 = vor.u32 1.1754944e-38, %v616_v52  ;;  %vm615_vm11 = vcmp.eq.f32.partialorder %v614_v20, 8.507059e+37  ;;  %v1212_v20 = vld [vmem:[%s2277_s5] sm:$0xff] }
  0xdf   :  { %1111 = vmatpush.bf16.msrb.mxu1 %v1706_v13  ;;  %v1241_v63 = vcvt.s32.f32 %v1225_v59  ;;  %v1238_v3 = vcvt.s32.f32 %v1222_v5  ;;  %v1221_v13 = vunpack.c.1.s8 %v1213_v1 }
  0xe0   :  { %1136 = vmatpush.bf16.msrb.mxu3 %v1726_v6  ;;  %v1223_v6 = vunpack.c.3.s8 %v1213_v1 }
  0xe1   :  { %1124 = vmatpush.bf16.msrb.mxu2 %v1582_v16  ;;  %v1252_v46 = vpack.c.bf16 %v1241_v63, %v1240_v61 }
  0xe2   :  { %v1985_v12 = vpop.eup %1984  ;;  %v1239_v8 = vcvt.s32.f32 %v1223_v6 }
  0xe3   :  { %v606_v15 = vmul.f32 %v1985_v12, %v604_v50  ;;  %vm611_vm8 = vweird.f32 %v1985_v12  ;;  %v1987_v22 = vpop.eup %1986 }
  0xe4   :  { %1137 = vmatpush.bf16.msrb.mxu3 %v1710_v17  ;;  %vm612_vm10 = vmor %vm610_vm9, %vm611_vm8  ;;  %v1251_v11 = vpack.c.bf16 %v1239_v8, %v1238_v3 }
  0xe5   :  { %v607_v62 = vsub.f32 1.0, %v606_v15 }
  0xe7   :  { %v608_v19 = vmul.f32 %v1985_v12, %v607_v62  ;;  %v1237_v62 = vcvt.s32.f32 %v1221_v13 }
  0xe9   :  { %v609_v18 = vadd.f32 %v1985_v12, %v608_v19 }
  0xeb   :  { %v613_v56 = vsel %vm612_vm10, %v1985_v12, %v609_v18  ;;  %v1220_v12 = vunpack.c.0.s8 %v1213_v1 }
  0xec   :  { %v618_v24 = vsel %vm615_vm11, %v617_v21, %v613_v56 }
  0xed   :  { %v624_v23 = vmul.f32 %v1987_v22, %v618_v24  ;;  %v1236_v17 = vcvt.s32.f32 %v1220_v12  ;;  %v1218_v22 = vunpack.c.2.s8 %v1212_v20  ;;  %v1219_v24 = vunpack.c.3.s8 %v1212_v20 }
  0xef   :  { %625 = vst [vmem:[%s2281_s9] sm:$0xff] %v624_v23  ;;  %v1964_v14 = vpack.c.bf16 %v1564_v25, %v624_v23  ;;  %v1250_v56 = vpack.c.bf16 %v1237_v62, %v1236_v17  ;;  %v1216_v25 = vunpack.c.0.s8 %v1212_v20  ;;  %v1217_v23 = vunpack.c.1.s8 %v1212_v20 }
  0xf1   :  { %v713_v26 = vunpack.c.l.b16 %v1964_v14  ;;  %v714_v27 = vunpack.c.h.b16 %v1964_v14  ;;  %v1234_v14 = vcvt.s32.f32 %v1218_v22  ;;  %v1233_v31 = vcvt.s32.f32 %v1217_v23 }
  0xf3   :  { %v715_v28 = vpack.c.b16 %v713_v26, %v713_v26  ;;  %v716_v29 = vpack.c.b16 %v714_v27, %v714_v27  ;;  %v1235_v26 = vcvt.s32.f32 %v1219_v24  ;;  %v1970_v24 = vld [vmem:[%s2278_s6] ss:$0 sm:$0xff] }
  0xf5   :  { %1047 = vmatmul.bf16.vlgmr.msra.gmra.mxu0 %v715_v28  ;;  %1060 = vmatmul.bf16.vlgmr.msra.gmra.mxu1 %v716_v29  ;;  %v1249_v34 = vpack.c.bf16 %v1235_v26, %v1234_v14 }
  0xf6   :  { %1073 = vmatmul.bf16.vlgmr.msra.gmra.mxu2 %v715_v28  ;;  %1086 = vmatmul.bf16.vlgmr.msra.gmra.mxu3 %v716_v29 }
  0xf7   :  { %1256 = vmatpush.bf16.msra.mxu0 %v1255_v36 }
  0xfb   :  { %1257 = vmatpush.bf16.msra.mxu0 %v1254_v47 }
  0xff   :  { %1258 = vmatpush.bf16.msra.mxu0 %v1253_v57 }
 0x103   :  { %1259 = vmatpush.bf16.msra.mxu0 %v1252_v46 }
 0x105   :  { %1099 = vmatmul.bf16.vlgmr.msrb.gmra.mxu0 %v715_v28  ;;  %1112 = vmatmul.bf16.vlgmr.msrb.gmra.mxu1 %v716_v29 }
 0x106   :  { %1125 = vmatmul.bf16.vlgmr.msrb.gmra.mxu2 %v715_v28  ;;  %1138 = vmatmul.bf16.vlgmr.msrb.gmra.mxu3 %v716_v29  ;;  %v707_v28 = vperm.slane %v2232_v33, 3  ;;  %v1232_v29 = vcvt.s32.f32 %v1216_v25  ;;  %v1971_v25 = vld [vmem:[%s2279_s7] ss:$0 sm:$0xff] }
 0x107   :  { %1260 = vmatpush.bf16.msra.mxu0 %v1251_v11 }
 0x10b   :  { %1261 = vmatpush.bf16.msra.mxu0 %v1250_v56 }
 0x10f   :  { %1262 = vmatpush.bf16.msra.mxu0 %v1249_v34 }
 0x172   :  { %v1048_v44 = vpop.f32.mrf.mxu0  ;;  %v1061_v45 = vpop.f32.mrf.mxu1 }
 0x173   :  { %v1049_v50 = vadd.f32 %v1048_v44, %v704_v40  ;;  %v1248_v40 = vpack.c.bf16 %v1233_v31, %v1232_v29 }
 0x175   :  { %v1062_v54 = vadd.f32 %v1061_v45, %v1049_v50  ;;  %1263 = vmatpush.bf16.msra.mxu0 %v1248_v40 }
 0x177   :  { %v1823_v60 = vmul.f32 -1.442695, %v1062_v54 }
 0x179   :  { %1988 = vpow2.f32 %v1823_v60  ;;  %v1074_v39 = vpop.f32.mrf.mxu2  ;;  %v1087_v0 = vpop.f32.mrf.mxu3 }
 0x17a   :  { %v1075_v2 = vadd.f32 %v1074_v39, %v705_v55  ;;  %v1050_v4 = vpop.f32.mrf.mxu0  ;;  %v1063_v9 = vpop.f32.mrf.mxu1 }
 0x17b   :  { %v1566_v9 = vld [vmem:[%s2274_s2 + $0x8] sm:$0xff] }
 0x17c   :  { %v1088_v7 = vadd.f32 %v1087_v0, %v1075_v2 }
 0x17e   :  { %v1824_v10 = vmul.f32 -1.442695, %v1088_v7 }
 0x17f   :  { %v1989_v15 = vpop.eup %1988 }
 0x180   :  { %v2242_v16 = vadd.f32 1.0, %v1989_v15  ;;  %1990 = vpow2.f32 %v1824_v10 }
 0x181   :  { %v1076_v52 = vpop.f32.mrf.mxu2  ;;  %v1089_v19 = vpop.f32.mrf.mxu3 }
 0x182   :  { %1992 = vrcp.f32 %v2242_v16  ;;  %v1100_v18 = vpop.f32.mrf.mxu0  ;;  %v1113_v21 = vpop.f32.mrf.mxu1  ;;  %v1158_v54 = vand.u32 2147483648, %v2242_v16  ;;  %vm1152_vm13 = vweird.f32 %v2242_v16  ;;  %v1156_v59 = vand.u32 2147483647, %v2242_v16 }
 0x183   :  { %v1101_v45 = vadd.f32 %v1100_v18, %v706_v32 }
 0x184   :  { %v1159_v0 = vor.u32 1.1754944e-38, %v1158_v54  ;;  %vm1157_vm1 = vcmp.eq.f32.partialorder %v1156_v59, 8.507059e+37 }
 0x185   :  { %v1114_v33 = vadd.f32 %v1113_v21, %v1101_v45 }
 0x186   :  { %v1991_v27 = vpop.eup %1990 }
 0x187   :  { %v1165_v30 = vadd.f32 1.0, %v1991_v27 }
 0x188   :  { %v1993_v35 = vpop.eup %1992 }
 0x189   :  { %v1148_v36 = vmul.f32 %v1993_v35, %v2242_v16  ;;  %1994 = vrcp.f32 %v1165_v30  ;;  %v1126_v37 = vpop.f32.mrf.mxu2  ;;  %v1139_v38 = vpop.f32.mrf.mxu3  ;;  %vm1153_vm12 = vweird.f32 %v1993_v35  ;;  %v1177_v60 = vand.u32 2147483648, %v1165_v30 }
 0x18a   :  { %v1127_v41 = vadd.f32 %v1126_v37, %v707_v28  ;;  %v1102_v42 = vpop.f32.mrf.mxu0  ;;  %v1115_v43 = vpop.f32.mrf.mxu1  ;;  %vm1154_vm14 = vmor %vm1152_vm13, %vm1153_vm12  ;;  %v1175_v39 = vand.u32 2147483647, %v1165_v30  ;;  %vm1171_vm0 = vweird.f32 %v1165_v30 }
 0x18b   :  { %v1149_v44 = vsub.f32 1.0, %v1148_v36  ;;  %v1178_v4 = vor.u32 1.1754944e-38, %v1177_v60 }
 0x18c   :  { %v1140_v47 = vadd.f32 %v1139_v38, %v1127_v41  ;;  %vm1176_vm3 = vcmp.eq.f32.partialorder %v1175_v39, 8.507059e+37 }
 0x18d   :  { %v1150_v48 = vmul.f32 %v1993_v35, %v1149_v44 }
 0x18e   :  { %v1825_v49 = vmul.f32 -1.442695, %v1140_v47 }
 0x18f   :  { %v1995_v50 = vpop.eup %1994  ;;  %v1151_v53 = vadd.f32 %v1993_v35, %v1150_v48 }
 0x190   :  { %v1167_v51 = vmul.f32 %v1995_v50, %v1165_v30  ;;  %1996 = vpow2.f32 %v1825_v49  ;;  %vm1172_vm15 = vweird.f32 %v1995_v50 }
 0x191   :  { %v1128_v55 = vpop.f32.mrf.mxu2  ;;  %v1141_v57 = vpop.f32.mrf.mxu3  ;;  %1998 = vtanh.f32 %v1114_v33  ;;  %v1155_v63 = vsel %vm1154_vm14, %v1993_v35, %v1151_v53  ;;  %vm1173_vm2 = vmor %vm1171_vm0, %vm1172_vm15 }
 0x192   :  { %v1168_v58 = vsub.f32 1.0, %v1167_v51  ;;  %v1160_v46 = vsel %vm1157_vm1, %v1159_v0, %v1155_v63 }
 0x194   :  { %v1169_v61 = vmul.f32 %v1995_v50, %v1168_v58 }
 0x196   :  { %v1997_v1 = vpop.eup %1996  ;;  %v1170_v2 = vadd.f32 %v1995_v50, %v1169_v61 }
 0x197   :  { %v1185_v5 = vadd.f32 1.0, %v1997_v1  ;;  %v1999_v7 = vpop.eup %1998 }
 0x198   :  { %v1174_v6 = vsel %vm1173_vm2, %v1995_v50, %v1170_v2  ;;  %v1202_v10 = vmul.f32 %v1999_v7, %v1160_v46 }
 0x199   :  { %v1179_v3 = vsel %vm1176_vm3, %v1178_v4, %v1174_v6  ;;  %2000 = vrcp.f32 %v1185_v5  ;;  %v1197_v16 = vand.u32 2147483648, %v1185_v5  ;;  %v1195_v62 = vand.u32 2147483647, %v1185_v5 }
 0x19a   :  { %v1201_v8 = vmul.f32 %v1566_v9, %v1179_v3  ;;  %vm1191_vm5 = vweird.f32 %v1185_v5 }
 0x19b   :  { %v1198_v19 = vor.u32 1.1754944e-38, %v1197_v16  ;;  %vm1196_vm7 = vcmp.eq.f32.partialorder %v1195_v62, 8.507059e+37 }
 0x19c   :  { %v1203_v11 = vadd.f32 %v1202_v10, %v1201_v8 }
 0x19e   :  { %1827 = vst [vmem:[%s2282_s10 + $0x8] sm:$0xff] %v1203_v11  ;;  %2002 = vtanh.f32 %v1203_v11 }
 0x19f   :  { %v2001_v12 = vpop.eup %2000 }
 0x1a0   :  { %v1187_v13 = vmul.f32 %v2001_v12, %v1185_v5  ;;  %vm1192_vm4 = vweird.f32 %v2001_v12 }
 0x1a1   :  { %vm1193_vm6 = vmor %vm1191_vm5, %vm1192_vm4 }
 0x1a2   :  { %v1188_v15 = vsub.f32 1.0, %v1187_v13 }
 0x1a4   :  { %v1189_v17 = vmul.f32 %v2001_v12, %v1188_v15  ;;  %v2003_v18 = vpop.eup %2002 }
 0x1a6   :  { %v1190_v52 = vadd.f32 %v2001_v12, %v1189_v17 }
 0x1a8   :  { %v1194_v20 = vsel %vm1193_vm6, %v2001_v12, %v1190_v52 }
 0x1a9   :  { %v1199_v21 = vsel %vm1196_vm7, %v1198_v19, %v1194_v20 }
 0x1aa   :  { %v1205_v56 = vmul.f32 %v2003_v18, %v1199_v21 }
 0x1ac   :  { %1826 = vst [vmem:[%s2281_s9 + $0x8] sm:$0xff] %v1205_v56  ;;  %v1210_v22 = vpack.c.bf16 %v1205_v56, %v1205_v56 }
 0x1ae   :  { %1264 = vmatmul.bf16.vlgmr.msra.gmra.mxu0 %v1210_v22 }
 0x22b   :  { %v1265_v23 = vpop.f32.mrf.mxu0 }
 0x22c   :  { %v1273_v14 = vmul.f32 %v1970_v24, %v1265_v23 }
 0x22e   :  { %v1278_v26 = vadd.f32 %v1971_v25, %v1273_v14 }
 0x230   :  { %1279 = vst [vmem:[#allocation6] sm:$0xff] %v1278_v26 }
 0x231   :  { %1290 = dma.vmem_to_hbm [thread:$0]  %s1286_s26, 128, %s1288_s29, [#allocation5]  }
 0x233   :  { %v1267_v27 = vpop.f32.mrf.mxu0 }
 0x234   :  { %2054 = dma.done.wait [#allocation5], 128  }
 0x235   :  { %2055 = vsyncadd [#allocation5], 4294967168 }
 0x236   :  { %1303 = vsyncpa [#allocation4], 1 }
 0x237   :  { %1304 = vsyncpa [#allocation5], 1 }

</bundles_post_ra>
